<compile_context>
chip_gen: v7x
topology: tpu7x:2x2x1
jax: 0.10.0
libtpu: 0.0.40
codegen_flags: <defaults>
</compile_context>

<pallas_src>
import math

import numpy as np
import jax
import jax.numpy as jnp
from jax import lax
from jax.experimental import pallas as pl
from jax.experimental.pallas import tpu as pltpu

# ------------------------- model hyper-parameters (small, deterministic) ----
S = 8            # sequence length
B = 2            # batch
E = 32           # d_model
H = 4            # nhead
D = E // H       # head dim
FF = 64          # dim_feedforward
NUM_LAYERS = 2
EPS = 1e-5       # PyTorch LayerNorm default eps


def _layer_norm(x, w, b):
    mu = jnp.mean(x, axis=-1, keepdims=True)
    var = jnp.mean((x - mu) ** 2, axis=-1, keepdims=True)
    return (x - mu) * lax.rsqrt(var + EPS) * w + b


# --------------------------------- fused kernel ------------------------------
def _make_fused_kernel(num_layers, num_heads, apply_final_norm, *, approx_recip=False):
    def kernel(x_ref, mask_ref,
               wqkv_ref, bqkv_ref, wo_ref, bo_ref,
               w1_ref, b1_ref, w2_ref, b2_ref,
               n1w_ref, n1b_ref, n2w_ref, n2b_ref,
               *rest):
        if apply_final_norm:
            fnw_ref, fnb_ref, o_ref = rest
        else:
            (o_ref,) = rest

        x = x_ref[...].astype(jnp.float32)        # (T, E) flattened tokens, T = S*B
        neg_mask = mask_ref[...]                   # (T, T) additive batch-block mask

        for li in range(num_layers):               # static unrolled layer loop
            # ---- fused QKV projection: single (T,E)x(E,3E) matmul -----------------
            # 1/sqrt(D) is pre-folded into the Q columns of wqkv/bqkv at pack time.
            qkv = jnp.dot(x, wqkv_ref[li],
                          preferred_element_type=jnp.float32) + bqkv_ref[li]
            q = qkv[:, :E]
            k = qkv[:, E:2 * E]
            v = qkv[:, 2 * E:]

            # ---- per-head scores, no K transpose (contract last dim of both) -------
            dn = (((1,), (1,)), ((), ()))          # q @ k^T without materializing k^T
            s = jnp.stack(
                [lax.dot_general(q[:, h * D:(h + 1) * D], k[:, h * D:(h + 1) * D],
                                 dn, preferred_element_type=jnp.float32)
                 for h in range(num_heads)], axis=0)          # (H, T, T)

            # ---- ONE masked softmax over all heads ---------------------------------
            s = s + neg_mask[None, :, :]
            s = s - jnp.max(s, axis=-1, keepdims=True)
            p = jnp.exp(s)
            denom = jnp.sum(p, axis=-1, keepdims=True)
            if approx_recip:
                p = p * pl.reciprocal(denom, approx=True)     # ~1e-3 rel error; off by default
            else:
                p = p / denom                                  # exact

            # ---- per-head PV, contexts assembled lane-contiguously -----------------
            ctx = jnp.concatenate(
                [jnp.dot(p[h], v[:, h * D:(h + 1) * D],
                         preferred_element_type=jnp.float32)
                 for h in range(num_heads)], axis=-1)          # (T, E)

            # ---- single out-projection matmul --------------------------------------
            attn = jnp.dot(ctx, wo_ref[li],
                           preferred_element_type=jnp.float32) + bo_ref[li]

            # dropout1 == identity (eval); post-LN
            h1 = _layer_norm(x + attn, n1w_ref[li], n1b_ref[li])

            # ---- feed-forward -------------------------------------------------------
            ff = jnp.dot(h1, w1_ref[li],
                         preferred_element_type=jnp.float32) + b1_ref[li]
            ff = jnp.maximum(ff, 0.0)
            ff = jnp.dot(ff, w2_ref[li],
                         preferred_element_type=jnp.float32) + b2_ref[li]

            # dropout2 == identity (eval); post-LN
            x = _layer_norm(h1 + ff, n2w_ref[li], n2b_ref[li])

        if apply_final_norm:
            x = _layer_norm(x, fnw_ref[...], fnb_ref[...])

        o_ref[...] = x.astype(o_ref.dtype)

    return kernel


# ------------------------- host-side weight packing --------------------------
def _pack_layer_params(layer_params):
    """PyTorch-layout per-layer params -> stacked, pre-transposed, lane-dense arrays.

    Returns (wqkv, bqkv, wo, bo, w1, b1, w2, b2, n1w, n1b, n2w, n2b), each stacked over layers.
    The 1/sqrt(D) attention scale is folded into the Q part of wqkv/bqkv.
    """
    scale = 1.0 / math.sqrt(D)
    col_scale = np.ones((3 * E,), np.float32)
    col_scale[:E] = scale
    col_scale = jnp.asarray(col_scale)

    wqkv, bqkv, wo, bo, w1, b1, w2, b2 = [], [], [], [], [], [], [], []
    n1w, n1b, n2w, n2b = [], [], [], []
    for (in_w, in_b, out_w, out_b, l1w, l1b, l2w, l2b, a1w, a1b, a2w, a2b) in layer_params:
        wqkv.append(in_w.T * col_scale[None, :])          # (E, 3E), Q cols pre-scaled
        bqkv.append(in_b.reshape(1, 3 * E) * col_scale[None, :])
        wo.append(out_w.T)                                # (E, E)
        bo.append(out_b.reshape(1, E))
        w1.append(l1w.T)                                  # (E, FF)
        b1.append(l1b.reshape(1, FF))
        w2.append(l2w.T)                                  # (FF, E)
        b2.append(l2b.reshape(1, E))
        n1w.append(a1w.reshape(1, E)); n1b.append(a1b.reshape(1, E))
        n2w.append(a2w.reshape(1, E)); n2b.append(a2b.reshape(1, E))
    stk = lambda xs: jnp.stack(xs, axis=0).astype(jnp.float32)
    return tuple(stk(v) for v in (wqkv, bqkv, wo, bo, w1, b1, w2, b2, n1w, n1b, n2w, n2b))


# --------------------------------- wrapper ------------------------------------
def agentformer_encoder(src_sbe, packed_params, final_norm_params=None):
    """src_sbe: (S, B, E) seq-first (PyTorch convention). Returns (S, B, E)."""
    s_len, batch, d_model = src_sbe.shape
    T = s_len * batch
    apply_final = final_norm_params is not None

    # (S, B, E) -> (S*B, E) is a free row-major reshape; flattened row t has batch id t % B.
    # The additive mask below MUST use the same convention.
    x2d = src_sbe.reshape(T, d_model)

    # Compile-time additive mask making attention block-diagonal over the batch.
    tok = np.arange(T)
    same_batch = (tok[:, None] % batch) == (tok[None, :] % batch)
    attn_bias = jnp.asarray(np.where(same_batch, 0.0, -1e30), dtype=jnp.float32)

    args = [x2d, attn_bias, *packed_params]
    if apply_final:
        fnw, fnb = final_norm_params
        args += [fnw.reshape(1, d_model).astype(jnp.float32),
                 fnb.reshape(1, d_model).astype(jnp.float32)]

    kernel = _make_fused_kernel(NUM_LAYERS, H, apply_final, approx_recip=False)
    vmem = pltpu.MemorySpace.VMEM
    out2d = pl.pallas_call(
        kernel,
        out_shape=jax.ShapeDtypeStruct((T, d_model), jnp.float32),
        in_specs=[pl.BlockSpec(memory_space=vmem) for _ in args],
        out_specs=pl.BlockSpec(memory_space=vmem),
    )(*args)
    return out2d.reshape(s_len, batch, d_model)


agentformer_encoder_jit = jax.jit(agentformer_encoder)


# --------------------------- pure-JAX reference ------------------------------
def _reference(src_sbe, layer_params, final_norm_params):
    x = jnp.transpose(src_sbe, (1, 0, 2))    # (B, S, E)
    for (in_w, in_b, out_w, out_b, l1w, l1b, l2w, l2b, n1w, n1b, n2w, n2b) in layer_params:
        def per_batch(xb):
            qkv = xb @ in_w.T + in_b
            q, k, v = qkv[:, :E], qkv[:, E:2 * E], qkv[:, 2 * E:]
            outs = []
            for h in range(H):
                qh = q[:, h * D:(h + 1) * D] / math.sqrt(D)
                kh = k[:, h * D:(h + 1) * D]
                vh = v[:, h * D:(h + 1) * D]
                p = jax.nn.softmax(qh @ kh.T, axis=-1)
                outs.append(p @ vh)
            a = jnp.concatenate(outs, -1) @ out_w.T + out_b
            h1 = _layer_norm(xb + a, n1w, n1b)
            ffv = jnp.maximum(h1 @ l1w.T + l1b, 0.0) @ l2w.T + l2b
            return _layer_norm(h1 + ffv, n2w, n2b)
        x = jax.vmap(per_batch)(x)
    if final_norm_params is not None:
        w, b = final_norm_params
        x = _layer_norm(x, w, b)
    return jnp.transpose(x, (1, 0, 2))


# --------------------------------- main --------------------------------------
def _init_params(key):
    """Deterministic init in PyTorch parameter layout."""
    def xavier(k, shape):
        fan_out, fan_in = shape
        lim = math.sqrt(6.0 / (fan_in + fan_out))
        return jax.random.uniform(k, shape, jnp.float32, -lim, lim)

    layer_params = []
    for _ in range(NUM_LAYERS):
        key, *ks = jax.random.split(key, 9)
        layer_params.append((
            xavier(ks[0], (3 * E, E)),                       # in_proj_weight
            0.02 * jax.random.normal(ks[1], (3 * E,)),       # in_proj_bias
            xavier(ks[2], (E, E)),                           # out_proj.weight
            0.02 * jax.random.normal(ks[3], (E,)),           # out_proj.bias
            xavier(ks[4], (FF, E)),                          # linear1.weight
            0.02 * jax.random.normal(ks[5], (FF,)),          # linear1.bias
            xavier(ks[6], (E, FF)),                          # linear2.weight
            0.02 * jax.random.normal(ks[7], (E,)),           # linear2.bias
            jnp.ones((E,), jnp.float32),                     # norm1.weight
            jnp.zeros((E,), jnp.float32),                    # norm1.bias
            jnp.ones((E,), jnp.float32),                     # norm2.weight
            jnp.zeros((E,), jnp.float32),                    # norm2.bias
        ))
    final_norm = (jnp.ones((E,), jnp.float32), jnp.zeros((E,), jnp.float32))
    return layer_params, final_norm, key


if __name__ == "__main__":
    key = jax.random.PRNGKey(0)
    layer_params, final_norm, key = _init_params(key)
    packed = _pack_layer_params(layer_params)

    key, k_src = jax.random.split(key)
    src = jax.random.normal(k_src, (S, B, E), jnp.float32)   # PyTorch (seq, batch, d_model)

    out = agentformer_encoder_jit(src, packed, final_norm)
    out = jax.block_until_ready(out)

    assert out.shape == (S, B, E)
    ref = _reference(src, layer_params, final_norm)
    assert bool(jnp.all(jnp.isfinite(out)))
    max_err = float(jnp.max(jnp.abs(out - ref)))
    assert jnp.allclose(out, ref, atol=1e-3, rtol=1e-3), max_err

    print("KERNEL_OK")
</pallas_src>

<mosaic_0001>
module attributes {stable_mosaic.version = 11 : i64} {
  func.func @kernel(%arg0: memref<16x32xf32, #tpu.memory_space<vmem>>, %arg1: memref<16x16xf32, #tpu.memory_space<vmem>>, %arg2: memref<2x32x96xf32, #tpu.memory_space<vmem>>, %arg3: memref<2x1x96xf32, #tpu.memory_space<vmem>>, %arg4: memref<2x32x32xf32, #tpu.memory_space<vmem>>, %arg5: memref<2x1x32xf32, #tpu.memory_space<vmem>>, %arg6: memref<2x32x64xf32, #tpu.memory_space<vmem>>, %arg7: memref<2x1x64xf32, #tpu.memory_space<vmem>>, %arg8: memref<2x64x32xf32, #tpu.memory_space<vmem>>, %arg9: memref<2x1x32xf32, #tpu.memory_space<vmem>>, %arg10: memref<2x1x32xf32, #tpu.memory_space<vmem>>, %arg11: memref<2x1x32xf32, #tpu.memory_space<vmem>>, %arg12: memref<2x1x32xf32, #tpu.memory_space<vmem>>, %arg13: memref<2x1x32xf32, #tpu.memory_space<vmem>>, %arg14: memref<1x32xf32, #tpu.memory_space<vmem>>, %arg15: memref<1x32xf32, #tpu.memory_space<vmem>>, %arg16: memref<16x32xf32, #tpu.memory_space<vmem>>) attributes {dimension_semantics = [], scalar_prefetch = 0 : i64, scratch_operands = 0 : i64, tpu.core_type = #tpu.core_type<tc>} {
    %c0 = arith.constant 0 : index
    %c0_0 = arith.constant 0 : index
    %0 = vector.load %arg0[%c0, %c0_0] : memref<16x32xf32, #tpu.memory_space<vmem>>, vector<16x32xf32>
    %c0_1 = arith.constant 0 : index
    %c0_2 = arith.constant 0 : index
    %1 = vector.load %arg1[%c0_1, %c0_2] : memref<16x16xf32, #tpu.memory_space<vmem>>, vector<16x16xf32>
    %c0_3 = arith.constant 0 : index
    %c0_4 = arith.constant 0 : index
    %c0_5 = arith.constant 0 : index
    %2 = vector.load %arg2[%c0_3, %c0_4, %c0_5] : memref<2x32x96xf32, #tpu.memory_space<vmem>>, vector<1x32x96xf32>
    %3 = vector.shape_cast %2 : vector<1x32x96xf32> to vector<32x96xf32>
    %cst = arith.constant dense<0.000000e+00> : vector<16x96xf32>
    %4 = tpu.matmul %0, %3, %cst {dimension_numbers = #tpu.dot_dimension_numbers<[1], [0], [0], [1], [0, 0, 1, 1], [], []>} : vector<16x32xf32>, vector<32x96xf32>, vector<16x96xf32> -> vector<16x96xf32>
    %c0_6 = arith.constant 0 : index
    %c0_7 = arith.constant 0 : index
    %c0_8 = arith.constant 0 : index
    %5 = vector.load %arg3[%c0_6, %c0_7, %c0_8] : memref<2x1x96xf32, #tpu.memory_space<vmem>>, vector<1x1x96xf32>
    %6 = vector.shape_cast %5 : vector<1x1x96xf32> to vector<1x96xf32>
    %7 = vector.broadcast %6 : vector<1x96xf32> to vector<16x96xf32>
    %8 = arith.addf %4, %7 : vector<16x96xf32>
    %9 = vector.extract_strided_slice %8 {offsets = [0, 0], sizes = [16, 32], strides = [1, 1]} : vector<16x96xf32> to vector<16x32xf32>
    %10 = vector.extract_strided_slice %8 {offsets = [0, 32], sizes = [16, 32], strides = [1, 1]} : vector<16x96xf32> to vector<16x32xf32>
    %11 = vector.extract_strided_slice %8 {offsets = [0, 64], sizes = [16, 32], strides = [1, 1]} : vector<16x96xf32> to vector<16x32xf32>
    %12 = vector.extract_strided_slice %9 {offsets = [0, 0], sizes = [16, 8], strides = [1, 1]} : vector<16x32xf32> to vector<16x8xf32>
    %13 = vector.extract_strided_slice %10 {offsets = [0, 0], sizes = [16, 8], strides = [1, 1]} : vector<16x32xf32> to vector<16x8xf32>
    %cst_9 = arith.constant dense<0.000000e+00> : vector<16x16xf32>
    %14 = tpu.matmul %12, %13, %cst_9 {dimension_numbers = #tpu.dot_dimension_numbers<[1], [1], [0], [0], [0, 0, 1, 0], [], []>} : vector<16x8xf32>, vector<16x8xf32>, vector<16x16xf32> -> vector<16x16xf32>
    %15 = vector.extract_strided_slice %9 {offsets = [0, 8], sizes = [16, 8], strides = [1, 1]} : vector<16x32xf32> to vector<16x8xf32>
    %16 = vector.extract_strided_slice %10 {offsets = [0, 8], sizes = [16, 8], strides = [1, 1]} : vector<16x32xf32> to vector<16x8xf32>
    %cst_10 = arith.constant dense<0.000000e+00> : vector<16x16xf32>
    %17 = tpu.matmul %15, %16, %cst_10 {dimension_numbers = #tpu.dot_dimension_numbers<[1], [1], [0], [0], [0, 0, 1, 0], [], []>} : vector<16x8xf32>, vector<16x8xf32>, vector<16x16xf32> -> vector<16x16xf32>
    %18 = vector.extract_strided_slice %9 {offsets = [0, 16], sizes = [16, 8], strides = [1, 1]} : vector<16x32xf32> to vector<16x8xf32>
    %19 = vector.extract_strided_slice %10 {offsets = [0, 16], sizes = [16, 8], strides = [1, 1]} : vector<16x32xf32> to vector<16x8xf32>
    %cst_11 = arith.constant dense<0.000000e+00> : vector<16x16xf32>
    %20 = tpu.matmul %18, %19, %cst_11 {dimension_numbers = #tpu.dot_dimension_numbers<[1], [1], [0], [0], [0, 0, 1, 0], [], []>} : vector<16x8xf32>, vector<16x8xf32>, vector<16x16xf32> -> vector<16x16xf32>
    %21 = vector.extract_strided_slice %9 {offsets = [0, 24], sizes = [16, 8], strides = [1, 1]} : vector<16x32xf32> to vector<16x8xf32>
    %22 = vector.extract_strided_slice %10 {offsets = [0, 24], sizes = [16, 8], strides = [1, 1]} : vector<16x32xf32> to vector<16x8xf32>
    %cst_12 = arith.constant dense<0.000000e+00> : vector<16x16xf32>
    %23 = tpu.matmul %21, %22, %cst_12 {dimension_numbers = #tpu.dot_dimension_numbers<[1], [1], [0], [0], [0, 0, 1, 0], [], []>} : vector<16x8xf32>, vector<16x8xf32>, vector<16x16xf32> -> vector<16x16xf32>
    %24 = vector.shape_cast %14 : vector<16x16xf32> to vector<1x16x16xf32>
    %25 = vector.shape_cast %17 : vector<16x16xf32> to vector<1x16x16xf32>
    %26 = vector.shape_cast %20 : vector<16x16xf32> to vector<1x16x16xf32>
    %27 = vector.shape_cast %23 : vector<16x16xf32> to vector<1x16x16xf32>
    %28 = tpu.concatenate %24, %25, %26, %27 in 0 : vector<1x16x16xf32>, vector<1x16x16xf32>, vector<1x16x16xf32>, vector<1x16x16xf32> -> vector<4x16x16xf32>
    %29 = vector.shape_cast %1 : vector<16x16xf32> to vector<1x16x16xf32>
    %30 = vector.broadcast %29 : vector<1x16x16xf32> to vector<4x16x16xf32>
    %31 = arith.addf %28, %30 : vector<4x16x16xf32>
    %cst_13 = arith.constant dense<0xFF800000> : vector<4x16xf32>
    %32 = vector.multi_reduction <maximumf>, %31, %cst_13 [2] : vector<4x16x16xf32> to vector<4x16xf32>
    %33 = vector.shape_cast %32 : vector<4x16xf32> to vector<4x16x1xf32>
    %34 = vector.broadcast %33 : vector<4x16x1xf32> to vector<4x16x16xf32>
    %35 = arith.subf %31, %34 : vector<4x16x16xf32>
    %36 = math.exp %35 : vector<4x16x16xf32>
    %cst_14 = arith.constant dense<0.000000e+00> : vector<4x16xf32>
    %37 = vector.multi_reduction <add>, %36, %cst_14 [2] : vector<4x16x16xf32> to vector<4x16xf32>
    %38 = vector.shape_cast %37 : vector<4x16xf32> to vector<4x16x1xf32>
    %39 = vector.broadcast %38 : vector<4x16x1xf32> to vector<4x16x16xf32>
    %40 = arith.divf %36, %39 : vector<4x16x16xf32>
    %41 = vector.extract_strided_slice %40 {offsets = [0, 0, 0], sizes = [1, 16, 16], strides = [1, 1, 1]} : vector<4x16x16xf32> to vector<1x16x16xf32>
    %42 = vector.shape_cast %41 : vector<1x16x16xf32> to vector<16x16xf32>
    %43 = vector.extract_strided_slice %11 {offsets = [0, 0], sizes = [16, 8], strides = [1, 1]} : vector<16x32xf32> to vector<16x8xf32>
    %cst_15 = arith.constant dense<0.000000e+00> : vector<16x8xf32>
    %44 = tpu.matmul %42, %43, %cst_15 {dimension_numbers = #tpu.dot_dimension_numbers<[1], [0], [0], [1], [0, 0, 1, 1], [], []>} : vector<16x16xf32>, vector<16x8xf32>, vector<16x8xf32> -> vector<16x8xf32>
    %45 = vector.extract_strided_slice %40 {offsets = [1, 0, 0], sizes = [1, 16, 16], strides = [1, 1, 1]} : vector<4x16x16xf32> to vector<1x16x16xf32>
    %46 = vector.shape_cast %45 : vector<1x16x16xf32> to vector<16x16xf32>
    %47 = vector.extract_strided_slice %11 {offsets = [0, 8], sizes = [16, 8], strides = [1, 1]} : vector<16x32xf32> to vector<16x8xf32>
    %cst_16 = arith.constant dense<0.000000e+00> : vector<16x8xf32>
    %48 = tpu.matmul %46, %47, %cst_16 {dimension_numbers = #tpu.dot_dimension_numbers<[1], [0], [0], [1], [0, 0, 1, 1], [], []>} : vector<16x16xf32>, vector<16x8xf32>, vector<16x8xf32> -> vector<16x8xf32>
    %49 = vector.extract_strided_slice %40 {offsets = [2, 0, 0], sizes = [1, 16, 16], strides = [1, 1, 1]} : vector<4x16x16xf32> to vector<1x16x16xf32>
    %50 = vector.shape_cast %49 : vector<1x16x16xf32> to vector<16x16xf32>
    %51 = vector.extract_strided_slice %11 {offsets = [0, 16], sizes = [16, 8], strides = [1, 1]} : vector<16x32xf32> to vector<16x8xf32>
    %cst_17 = arith.constant dense<0.000000e+00> : vector<16x8xf32>
    %52 = tpu.matmul %50, %51, %cst_17 {dimension_numbers = #tpu.dot_dimension_numbers<[1], [0], [0], [1], [0, 0, 1, 1], [], []>} : vector<16x16xf32>, vector<16x8xf32>, vector<16x8xf32> -> vector<16x8xf32>
    %53 = vector.extract_strided_slice %40 {offsets = [3, 0, 0], sizes = [1, 16, 16], strides = [1, 1, 1]} : vector<4x16x16xf32> to vector<1x16x16xf32>
    %54 = vector.shape_cast %53 : vector<1x16x16xf32> to vector<16x16xf32>
    %55 = vector.extract_strided_slice %11 {offsets = [0, 24], sizes = [16, 8], strides = [1, 1]} : vector<16x32xf32> to vector<16x8xf32>
    %cst_18 = arith.constant dense<0.000000e+00> : vector<16x8xf32>
    %56 = tpu.matmul %54, %55, %cst_18 {dimension_numbers = #tpu.dot_dimension_numbers<[1], [0], [0], [1], [0, 0, 1, 1], [], []>} : vector<16x16xf32>, vector<16x8xf32>, vector<16x8xf32> -> vector<16x8xf32>
    %57 = tpu.concatenate %44, %48, %52, %56 in 1 : vector<16x8xf32>, vector<16x8xf32>, vector<16x8xf32>, vector<16x8xf32> -> vector<16x32xf32>
    %c0_19 = arith.constant 0 : index
    %c0_20 = arith.constant 0 : index
    %c0_21 = arith.constant 0 : index
    %58 = vector.load %arg4[%c0_19, %c0_20, %c0_21] : memref<2x32x32xf32, #tpu.memory_space<vmem>>, vector<1x32x32xf32>
    %59 = vector.shape_cast %58 : vector<1x32x32xf32> to vector<32x32xf32>
    %cst_22 = arith.constant dense<0.000000e+00> : vector<16x32xf32>
    %60 = tpu.matmul %57, %59, %cst_22 {dimension_numbers = #tpu.dot_dimension_numbers<[1], [0], [0], [1], [0, 0, 1, 1], [], []>} : vector<16x32xf32>, vector<32x32xf32>, vector<16x32xf32> -> vector<16x32xf32>
    %c0_23 = arith.constant 0 : index
    %c0_24 = arith.constant 0 : index
    %c0_25 = arith.constant 0 : index
    %61 = vector.load %arg5[%c0_23, %c0_24, %c0_25] : memref<2x1x32xf32, #tpu.memory_space<vmem>>, vector<1x1x32xf32>
    %62 = vector.shape_cast %61 : vector<1x1x32xf32> to vector<1x32xf32>
    %63 = vector.broadcast %62 : vector<1x32xf32> to vector<16x32xf32>
    %64 = arith.addf %60, %63 : vector<16x32xf32>
    %65 = arith.addf %0, %64 : vector<16x32xf32>
    %c0_26 = arith.constant 0 : index
    %c0_27 = arith.constant 0 : index
    %c0_28 = arith.constant 0 : index
    %66 = vector.load %arg10[%c0_26, %c0_27, %c0_28] : memref<2x1x32xf32, #tpu.memory_space<vmem>>, vector<1x1x32xf32>
    %67 = vector.shape_cast %66 : vector<1x1x32xf32> to vector<1x32xf32>
    %c0_29 = arith.constant 0 : index
    %c0_30 = arith.constant 0 : index
    %c0_31 = arith.constant 0 : index
    %68 = vector.load %arg11[%c0_29, %c0_30, %c0_31] : memref<2x1x32xf32, #tpu.memory_space<vmem>>, vector<1x1x32xf32>
    %69 = vector.shape_cast %68 : vector<1x1x32xf32> to vector<1x32xf32>
    %cst_32 = arith.constant dense<0.000000e+00> : vector<16xf32>
    %70 = vector.multi_reduction <add>, %65, %cst_32 [1] : vector<16x32xf32> to vector<16xf32>
    %71 = vector.shape_cast %70 : vector<16xf32> to vector<16x1xf32>
    %cst_33 = arith.constant 3.200000e+01 : f32
    %72 = vector.broadcast %cst_33 : f32 to vector<16x1xf32>
    %73 = arith.divf %71, %72 : vector<16x1xf32>
    %74 = vector.broadcast %73 : vector<16x1xf32> to vector<16x32xf32>
    %75 = arith.subf %65, %74 : vector<16x32xf32>
    %76 = arith.mulf %75, %75 : vector<16x32xf32>
    %cst_34 = arith.constant dense<0.000000e+00> : vector<16xf32>
    %77 = vector.multi_reduction <add>, %76, %cst_34 [1] : vector<16x32xf32> to vector<16xf32>
    %78 = vector.shape_cast %77 : vector<16xf32> to vector<16x1xf32>
    %cst_35 = arith.constant 3.200000e+01 : f32
    %79 = vector.broadcast %cst_35 : f32 to vector<16x1xf32>
    %80 = arith.divf %78, %79 : vector<16x1xf32>
    %81 = vector.broadcast %73 : vector<16x1xf32> to vector<16x32xf32>
    %82 = arith.subf %65, %81 : vector<16x32xf32>
    %cst_36 = arith.constant 9.99999974E-6 : f32
    %83 = vector.broadcast %cst_36 : f32 to vector<16x1xf32>
    %84 = arith.addf %80, %83 : vector<16x1xf32>
    %85 = math.rsqrt %84 : vector<16x1xf32>
    %86 = vector.broadcast %85 : vector<16x1xf32> to vector<16x32xf32>
    %87 = arith.mulf %82, %86 : vector<16x32xf32>
    %88 = vector.broadcast %67 : vector<1x32xf32> to vector<16x32xf32>
    %89 = arith.mulf %87, %88 : vector<16x32xf32>
    %90 = vector.broadcast %69 : vector<1x32xf32> to vector<16x32xf32>
    %91 = arith.addf %89, %90 : vector<16x32xf32>
    %c0_37 = arith.constant 0 : index
    %c0_38 = arith.constant 0 : index
    %c0_39 = arith.constant 0 : index
    %92 = vector.load %arg6[%c0_37, %c0_38, %c0_39] : memref<2x32x64xf32, #tpu.memory_space<vmem>>, vector<1x32x64xf32>
    %93 = vector.shape_cast %92 : vector<1x32x64xf32> to vector<32x64xf32>
    %cst_40 = arith.constant dense<0.000000e+00> : vector<16x64xf32>
    %94 = tpu.matmul %91, %93, %cst_40 {dimension_numbers = #tpu.dot_dimension_numbers<[1], [0], [0], [1], [0, 0, 1, 1], [], []>} : vector<16x32xf32>, vector<32x64xf32>, vector<16x64xf32> -> vector<16x64xf32>
    %c0_41 = arith.constant 0 : index
    %c0_42 = arith.constant 0 : index
    %c0_43 = arith.constant 0 : index
    %95 = vector.load %arg7[%c0_41, %c0_42, %c0_43] : memref<2x1x64xf32, #tpu.memory_space<vmem>>, vector<1x1x64xf32>
    %96 = vector.shape_cast %95 : vector<1x1x64xf32> to vector<1x64xf32>
    %97 = vector.broadcast %96 : vector<1x64xf32> to vector<16x64xf32>
    %98 = arith.addf %94, %97 : vector<16x64xf32>
    %cst_44 = arith.constant 0.000000e+00 : f32
    %99 = vector.broadcast %cst_44 : f32 to vector<16x64xf32>
    %100 = arith.maximumf %98, %99 : vector<16x64xf32>
    %c0_45 = arith.constant 0 : index
    %c0_46 = arith.constant 0 : index
    %c0_47 = arith.constant 0 : index
    %101 = vector.load %arg8[%c0_45, %c0_46, %c0_47] : memref<2x64x32xf32, #tpu.memory_space<vmem>>, vector<1x64x32xf32>
    %102 = vector.shape_cast %101 : vector<1x64x32xf32> to vector<64x32xf32>
    %cst_48 = arith.constant dense<0.000000e+00> : vector<16x32xf32>
    %103 = tpu.matmul %100, %102, %cst_48 {dimension_numbers = #tpu.dot_dimension_numbers<[1], [0], [0], [1], [0, 0, 1, 1], [], []>} : vector<16x64xf32>, vector<64x32xf32>, vector<16x32xf32> -> vector<16x32xf32>
    %c0_49 = arith.constant 0 : index
    %c0_50 = arith.constant 0 : index
    %c0_51 = arith.constant 0 : index
    %104 = vector.load %arg9[%c0_49, %c0_50, %c0_51] : memref<2x1x32xf32, #tpu.memory_space<vmem>>, vector<1x1x32xf32>
    %105 = vector.shape_cast %104 : vector<1x1x32xf32> to vector<1x32xf32>
    %106 = vector.broadcast %105 : vector<1x32xf32> to vector<16x32xf32>
    %107 = arith.addf %103, %106 : vector<16x32xf32>
    %108 = arith.addf %91, %107 : vector<16x32xf32>
    %c0_52 = arith.constant 0 : index
    %c0_53 = arith.constant 0 : index
    %c0_54 = arith.constant 0 : index
    %109 = vector.load %arg12[%c0_52, %c0_53, %c0_54] : memref<2x1x32xf32, #tpu.memory_space<vmem>>, vector<1x1x32xf32>
    %110 = vector.shape_cast %109 : vector<1x1x32xf32> to vector<1x32xf32>
    %c0_55 = arith.constant 0 : index
    %c0_56 = arith.constant 0 : index
    %c0_57 = arith.constant 0 : index
    %111 = vector.load %arg13[%c0_55, %c0_56, %c0_57] : memref<2x1x32xf32, #tpu.memory_space<vmem>>, vector<1x1x32xf32>
    %112 = vector.shape_cast %111 : vector<1x1x32xf32> to vector<1x32xf32>
    %cst_58 = arith.constant dense<0.000000e+00> : vector<16xf32>
    %113 = vector.multi_reduction <add>, %108, %cst_58 [1] : vector<16x32xf32> to vector<16xf32>
    %114 = vector.shape_cast %113 : vector<16xf32> to vector<16x1xf32>
    %cst_59 = arith.constant 3.200000e+01 : f32
    %115 = vector.broadcast %cst_59 : f32 to vector<16x1xf32>
    %116 = arith.divf %114, %115 : vector<16x1xf32>
    %117 = vector.broadcast %116 : vector<16x1xf32> to vector<16x32xf32>
    %118 = arith.subf %108, %117 : vector<16x32xf32>
    %119 = arith.mulf %118, %118 : vector<16x32xf32>
    %cst_60 = arith.constant dense<0.000000e+00> : vector<16xf32>
    %120 = vector.multi_reduction <add>, %119, %cst_60 [1] : vector<16x32xf32> to vector<16xf32>
    %121 = vector.shape_cast %120 : vector<16xf32> to vector<16x1xf32>
    %cst_61 = arith.constant 3.200000e+01 : f32
    %122 = vector.broadcast %cst_61 : f32 to vector<16x1xf32>
    %123 = arith.divf %121, %122 : vector<16x1xf32>
    %124 = vector.broadcast %116 : vector<16x1xf32> to vector<16x32xf32>
    %125 = arith.subf %108, %124 : vector<16x32xf32>
    %cst_62 = arith.constant 9.99999974E-6 : f32
    %126 = vector.broadcast %cst_62 : f32 to vector<16x1xf32>
    %127 = arith.addf %123, %126 : vector<16x1xf32>
    %128 = math.rsqrt %127 : vector<16x1xf32>
    %129 = vector.broadcast %128 : vector<16x1xf32> to vector<16x32xf32>
    %130 = arith.mulf %125, %129 : vector<16x32xf32>
    %131 = vector.broadcast %110 : vector<1x32xf32> to vector<16x32xf32>
    %132 = arith.mulf %130, %131 : vector<16x32xf32>
    %133 = vector.broadcast %112 : vector<1x32xf32> to vector<16x32xf32>
    %134 = arith.addf %132, %133 : vector<16x32xf32>
    %c1 = arith.constant 1 : index
    %c0_63 = arith.constant 0 : index
    %c0_64 = arith.constant 0 : index
    %135 = vector.load %arg2[%c1, %c0_63, %c0_64] : memref<2x32x96xf32, #tpu.memory_space<vmem>>, vector<1x32x96xf32>
    %136 = vector.shape_cast %135 : vector<1x32x96xf32> to vector<32x96xf32>
    %cst_65 = arith.constant dense<0.000000e+00> : vector<16x96xf32>
    %137 = tpu.matmul %134, %136, %cst_65 {dimension_numbers = #tpu.dot_dimension_numbers<[1], [0], [0], [1], [0, 0, 1, 1], [], []>} : vector<16x32xf32>, vector<32x96xf32>, vector<16x96xf32> -> vector<16x96xf32>
    %c1_66 = arith.constant 1 : index
    %c0_67 = arith.constant 0 : index
    %c0_68 = arith.constant 0 : index
    %138 = vector.load %arg3[%c1_66, %c0_67, %c0_68] : memref<2x1x96xf32, #tpu.memory_space<vmem>>, vector<1x1x96xf32>
    %139 = vector.shape_cast %138 : vector<1x1x96xf32> to vector<1x96xf32>
    %140 = vector.broadcast %139 : vector<1x96xf32> to vector<16x96xf32>
    %141 = arith.addf %137, %140 : vector<16x96xf32>
    %142 = vector.extract_strided_slice %141 {offsets = [0, 0], sizes = [16, 32], strides = [1, 1]} : vector<16x96xf32> to vector<16x32xf32>
    %143 = vector.extract_strided_slice %141 {offsets = [0, 32], sizes = [16, 32], strides = [1, 1]} : vector<16x96xf32> to vector<16x32xf32>
    %144 = vector.extract_strided_slice %141 {offsets = [0, 64], sizes = [16, 32], strides = [1, 1]} : vector<16x96xf32> to vector<16x32xf32>
    %145 = vector.extract_strided_slice %142 {offsets = [0, 0], sizes = [16, 8], strides = [1, 1]} : vector<16x32xf32> to vector<16x8xf32>
    %146 = vector.extract_strided_slice %143 {offsets = [0, 0], sizes = [16, 8], strides = [1, 1]} : vector<16x32xf32> to vector<16x8xf32>
    %cst_69 = arith.constant dense<0.000000e+00> : vector<16x16xf32>
    %147 = tpu.matmul %145, %146, %cst_69 {dimension_numbers = #tpu.dot_dimension_numbers<[1], [1], [0], [0], [0, 0, 1, 0], [], []>} : vector<16x8xf32>, vector<16x8xf32>, vector<16x16xf32> -> vector<16x16xf32>
    %148 = vector.extract_strided_slice %142 {offsets = [0, 8], sizes = [16, 8], strides = [1, 1]} : vector<16x32xf32> to vector<16x8xf32>
    %149 = vector.extract_strided_slice %143 {offsets = [0, 8], sizes = [16, 8], strides = [1, 1]} : vector<16x32xf32> to vector<16x8xf32>
    %cst_70 = arith.constant dense<0.000000e+00> : vector<16x16xf32>
    %150 = tpu.matmul %148, %149, %cst_70 {dimension_numbers = #tpu.dot_dimension_numbers<[1], [1], [0], [0], [0, 0, 1, 0], [], []>} : vector<16x8xf32>, vector<16x8xf32>, vector<16x16xf32> -> vector<16x16xf32>
    %151 = vector.extract_strided_slice %142 {offsets = [0, 16], sizes = [16, 8], strides = [1, 1]} : vector<16x32xf32> to vector<16x8xf32>
    %152 = vector.extract_strided_slice %143 {offsets = [0, 16], sizes = [16, 8], strides = [1, 1]} : vector<16x32xf32> to vector<16x8xf32>
    %cst_71 = arith.constant dense<0.000000e+00> : vector<16x16xf32>
    %153 = tpu.matmul %151, %152, %cst_71 {dimension_numbers = #tpu.dot_dimension_numbers<[1], [1], [0], [0], [0, 0, 1, 0], [], []>} : vector<16x8xf32>, vector<16x8xf32>, vector<16x16xf32> -> vector<16x16xf32>
    %154 = vector.extract_strided_slice %142 {offsets = [0, 24], sizes = [16, 8], strides = [1, 1]} : vector<16x32xf32> to vector<16x8xf32>
    %155 = vector.extract_strided_slice %143 {offsets = [0, 24], sizes = [16, 8], strides = [1, 1]} : vector<16x32xf32> to vector<16x8xf32>
    %cst_72 = arith.constant dense<0.000000e+00> : vector<16x16xf32>
    %156 = tpu.matmul %154, %155, %cst_72 {dimension_numbers = #tpu.dot_dimension_numbers<[1], [1], [0], [0], [0, 0, 1, 0], [], []>} : vector<16x8xf32>, vector<16x8xf32>, vector<16x16xf32> -> vector<16x16xf32>
    %157 = vector.shape_cast %147 : vector<16x16xf32> to vector<1x16x16xf32>
    %158 = vector.shape_cast %150 : vector<16x16xf32> to vector<1x16x16xf32>
    %159 = vector.shape_cast %153 : vector<16x16xf32> to vector<1x16x16xf32>
    %160 = vector.shape_cast %156 : vector<16x16xf32> to vector<1x16x16xf32>
    %161 = tpu.concatenate %157, %158, %159, %160 in 0 : vector<1x16x16xf32>, vector<1x16x16xf32>, vector<1x16x16xf32>, vector<1x16x16xf32> -> vector<4x16x16xf32>
    %162 = vector.shape_cast %1 : vector<16x16xf32> to vector<1x16x16xf32>
    %163 = vector.broadcast %162 : vector<1x16x16xf32> to vector<4x16x16xf32>
    %164 = arith.addf %161, %163 : vector<4x16x16xf32>
    %cst_73 = arith.constant dense<0xFF800000> : vector<4x16xf32>
    %165 = vector.multi_reduction <maximumf>, %164, %cst_73 [2] : vector<4x16x16xf32> to vector<4x16xf32>
    %166 = vector.shape_cast %165 : vector<4x16xf32> to vector<4x16x1xf32>
    %167 = vector.broadcast %166 : vector<4x16x1xf32> to vector<4x16x16xf32>
    %168 = arith.subf %164, %167 : vector<4x16x16xf32>
    %169 = math.exp %168 : vector<4x16x16xf32>
    %cst_74 = arith.constant dense<0.000000e+00> : vector<4x16xf32>
    %170 = vector.multi_reduction <add>, %169, %cst_74 [2] : vector<4x16x16xf32> to vector<4x16xf32>
    %171 = vector.shape_cast %170 : vector<4x16xf32> to vector<4x16x1xf32>
    %172 = vector.broadcast %171 : vector<4x16x1xf32> to vector<4x16x16xf32>
    %173 = arith.divf %169, %172 : vector<4x16x16xf32>
    %174 = vector.extract_strided_slice %173 {offsets = [0, 0, 0], sizes = [1, 16, 16], strides = [1, 1, 1]} : vector<4x16x16xf32> to vector<1x16x16xf32>
    %175 = vector.shape_cast %174 : vector<1x16x16xf32> to vector<16x16xf32>
    %176 = vector.extract_strided_slice %144 {offsets = [0, 0], sizes = [16, 8], strides = [1, 1]} : vector<16x32xf32> to vector<16x8xf32>
    %cst_75 = arith.constant dense<0.000000e+00> : vector<16x8xf32>
    %177 = tpu.matmul %175, %176, %cst_75 {dimension_numbers = #tpu.dot_dimension_numbers<[1], [0], [0], [1], [0, 0, 1, 1], [], []>} : vector<16x16xf32>, vector<16x8xf32>, vector<16x8xf32> -> vector<16x8xf32>
    %178 = vector.extract_strided_slice %173 {offsets = [1, 0, 0], sizes = [1, 16, 16], strides = [1, 1, 1]} : vector<4x16x16xf32> to vector<1x16x16xf32>
    %179 = vector.shape_cast %178 : vector<1x16x16xf32> to vector<16x16xf32>
    %180 = vector.extract_strided_slice %144 {offsets = [0, 8], sizes = [16, 8], strides = [1, 1]} : vector<16x32xf32> to vector<16x8xf32>
    %cst_76 = arith.constant dense<0.000000e+00> : vector<16x8xf32>
    %181 = tpu.matmul %179, %180, %cst_76 {dimension_numbers = #tpu.dot_dimension_numbers<[1], [0], [0], [1], [0, 0, 1, 1], [], []>} : vector<16x16xf32>, vector<16x8xf32>, vector<16x8xf32> -> vector<16x8xf32>
    %182 = vector.extract_strided_slice %173 {offsets = [2, 0, 0], sizes = [1, 16, 16], strides = [1, 1, 1]} : vector<4x16x16xf32> to vector<1x16x16xf32>
    %183 = vector.shape_cast %182 : vector<1x16x16xf32> to vector<16x16xf32>
    %184 = vector.extract_strided_slice %144 {offsets = [0, 16], sizes = [16, 8], strides = [1, 1]} : vector<16x32xf32> to vector<16x8xf32>
    %cst_77 = arith.constant dense<0.000000e+00> : vector<16x8xf32>
    %185 = tpu.matmul %183, %184, %cst_77 {dimension_numbers = #tpu.dot_dimension_numbers<[1], [0], [0], [1], [0, 0, 1, 1], [], []>} : vector<16x16xf32>, vector<16x8xf32>, vector<16x8xf32> -> vector<16x8xf32>
    %186 = vector.extract_strided_slice %173 {offsets = [3, 0, 0], sizes = [1, 16, 16], strides = [1, 1, 1]} : vector<4x16x16xf32> to vector<1x16x16xf32>
    %187 = vector.shape_cast %186 : vector<1x16x16xf32> to vector<16x16xf32>
    %188 = vector.extract_strided_slice %144 {offsets = [0, 24], sizes = [16, 8], strides = [1, 1]} : vector<16x32xf32> to vector<16x8xf32>
    %cst_78 = arith.constant dense<0.000000e+00> : vector<16x8xf32>
    %189 = tpu.matmul %187, %188, %cst_78 {dimension_numbers = #tpu.dot_dimension_numbers<[1], [0], [0], [1], [0, 0, 1, 1], [], []>} : vector<16x16xf32>, vector<16x8xf32>, vector<16x8xf32> -> vector<16x8xf32>
    %190 = tpu.concatenate %177, %181, %185, %189 in 1 : vector<16x8xf32>, vector<16x8xf32>, vector<16x8xf32>, vector<16x8xf32> -> vector<16x32xf32>
    %c1_79 = arith.constant 1 : index
    %c0_80 = arith.constant 0 : index
    %c0_81 = arith.constant 0 : index
    %191 = vector.load %arg4[%c1_79, %c0_80, %c0_81] : memref<2x32x32xf32, #tpu.memory_space<vmem>>, vector<1x32x32xf32>
    %192 = vector.shape_cast %191 : vector<1x32x32xf32> to vector<32x32xf32>
    %cst_82 = arith.constant dense<0.000000e+00> : vector<16x32xf32>
    %193 = tpu.matmul %190, %192, %cst_82 {dimension_numbers = #tpu.dot_dimension_numbers<[1], [0], [0], [1], [0, 0, 1, 1], [], []>} : vector<16x32xf32>, vector<32x32xf32>, vector<16x32xf32> -> vector<16x32xf32>
    %c1_83 = arith.constant 1 : index
    %c0_84 = arith.constant 0 : index
    %c0_85 = arith.constant 0 : index
    %194 = vector.load %arg5[%c1_83, %c0_84, %c0_85] : memref<2x1x32xf32, #tpu.memory_space<vmem>>, vector<1x1x32xf32>
    %195 = vector.shape_cast %194 : vector<1x1x32xf32> to vector<1x32xf32>
    %196 = vector.broadcast %195 : vector<1x32xf32> to vector<16x32xf32>
    %197 = arith.addf %193, %196 : vector<16x32xf32>
    %198 = arith.addf %134, %197 : vector<16x32xf32>
    %c1_86 = arith.constant 1 : index
    %c0_87 = arith.constant 0 : index
    %c0_88 = arith.constant 0 : index
    %199 = vector.load %arg10[%c1_86, %c0_87, %c0_88] : memref<2x1x32xf32, #tpu.memory_space<vmem>>, vector<1x1x32xf32>
    %200 = vector.shape_cast %199 : vector<1x1x32xf32> to vector<1x32xf32>
    %c1_89 = arith.constant 1 : index
    %c0_90 = arith.constant 0 : index
    %c0_91 = arith.constant 0 : index
    %201 = vector.load %arg11[%c1_89, %c0_90, %c0_91] : memref<2x1x32xf32, #tpu.memory_space<vmem>>, vector<1x1x32xf32>
    %202 = vector.shape_cast %201 : vector<1x1x32xf32> to vector<1x32xf32>
    %cst_92 = arith.constant dense<0.000000e+00> : vector<16xf32>
    %203 = vector.multi_reduction <add>, %198, %cst_92 [1] : vector<16x32xf32> to vector<16xf32>
    %204 = vector.shape_cast %203 : vector<16xf32> to vector<16x1xf32>
    %cst_93 = arith.constant 3.200000e+01 : f32
    %205 = vector.broadcast %cst_93 : f32 to vector<16x1xf32>
    %206 = arith.divf %204, %205 : vector<16x1xf32>
    %207 = vector.broadcast %206 : vector<16x1xf32> to vector<16x32xf32>
    %208 = arith.subf %198, %207 : vector<16x32xf32>
    %209 = arith.mulf %208, %208 : vector<16x32xf32>
    %cst_94 = arith.constant dense<0.000000e+00> : vector<16xf32>
    %210 = vector.multi_reduction <add>, %209, %cst_94 [1] : vector<16x32xf32> to vector<16xf32>
    %211 = vector.shape_cast %210 : vector<16xf32> to vector<16x1xf32>
    %cst_95 = arith.constant 3.200000e+01 : f32
    %212 = vector.broadcast %cst_95 : f32 to vector<16x1xf32>
    %213 = arith.divf %211, %212 : vector<16x1xf32>
    %214 = vector.broadcast %206 : vector<16x1xf32> to vector<16x32xf32>
    %215 = arith.subf %198, %214 : vector<16x32xf32>
    %cst_96 = arith.constant 9.99999974E-6 : f32
    %216 = vector.broadcast %cst_96 : f32 to vector<16x1xf32>
    %217 = arith.addf %213, %216 : vector<16x1xf32>
    %218 = math.rsqrt %217 : vector<16x1xf32>
    %219 = vector.broadcast %218 : vector<16x1xf32> to vector<16x32xf32>
    %220 = arith.mulf %215, %219 : vector<16x32xf32>
    %221 = vector.broadcast %200 : vector<1x32xf32> to vector<16x32xf32>
    %222 = arith.mulf %220, %221 : vector<16x32xf32>
    %223 = vector.broadcast %202 : vector<1x32xf32> to vector<16x32xf32>
    %224 = arith.addf %222, %223 : vector<16x32xf32>
    %c1_97 = arith.constant 1 : index
    %c0_98 = arith.constant 0 : index
    %c0_99 = arith.constant 0 : index
    %225 = vector.load %arg6[%c1_97, %c0_98, %c0_99] : memref<2x32x64xf32, #tpu.memory_space<vmem>>, vector<1x32x64xf32>
    %226 = vector.shape_cast %225 : vector<1x32x64xf32> to vector<32x64xf32>
    %cst_100 = arith.constant dense<0.000000e+00> : vector<16x64xf32>
    %227 = tpu.matmul %224, %226, %cst_100 {dimension_numbers = #tpu.dot_dimension_numbers<[1], [0], [0], [1], [0, 0, 1, 1], [], []>} : vector<16x32xf32>, vector<32x64xf32>, vector<16x64xf32> -> vector<16x64xf32>
    %c1_101 = arith.constant 1 : index
    %c0_102 = arith.constant 0 : index
    %c0_103 = arith.constant 0 : index
    %228 = vector.load %arg7[%c1_101, %c0_102, %c0_103] : memref<2x1x64xf32, #tpu.memory_space<vmem>>, vector<1x1x64xf32>
    %229 = vector.shape_cast %228 : vector<1x1x64xf32> to vector<1x64xf32>
    %230 = vector.broadcast %229 : vector<1x64xf32> to vector<16x64xf32>
    %231 = arith.addf %227, %230 : vector<16x64xf32>
    %cst_104 = arith.constant 0.000000e+00 : f32
    %232 = vector.broadcast %cst_104 : f32 to vector<16x64xf32>
    %233 = arith.maximumf %231, %232 : vector<16x64xf32>
    %c1_105 = arith.constant 1 : index
    %c0_106 = arith.constant 0 : index
    %c0_107 = arith.constant 0 : index
    %234 = vector.load %arg8[%c1_105, %c0_106, %c0_107] : memref<2x64x32xf32, #tpu.memory_space<vmem>>, vector<1x64x32xf32>
    %235 = vector.shape_cast %234 : vector<1x64x32xf32> to vector<64x32xf32>
    %cst_108 = arith.constant dense<0.000000e+00> : vector<16x32xf32>
    %236 = tpu.matmul %233, %235, %cst_108 {dimension_numbers = #tpu.dot_dimension_numbers<[1], [0], [0], [1], [0, 0, 1, 1], [], []>} : vector<16x64xf32>, vector<64x32xf32>, vector<16x32xf32> -> vector<16x32xf32>
    %c1_109 = arith.constant 1 : index
    %c0_110 = arith.constant 0 : index
    %c0_111 = arith.constant 0 : index
    %237 = vector.load %arg9[%c1_109, %c0_110, %c0_111] : memref<2x1x32xf32, #tpu.memory_space<vmem>>, vector<1x1x32xf32>
    %238 = vector.shape_cast %237 : vector<1x1x32xf32> to vector<1x32xf32>
    %239 = vector.broadcast %238 : vector<1x32xf32> to vector<16x32xf32>
    %240 = arith.addf %236, %239 : vector<16x32xf32>
    %241 = arith.addf %224, %240 : vector<16x32xf32>
    %c1_112 = arith.constant 1 : index
    %c0_113 = arith.constant 0 : index
    %c0_114 = arith.constant 0 : index
    %242 = vector.load %arg12[%c1_112, %c0_113, %c0_114] : memref<2x1x32xf32, #tpu.memory_space<vmem>>, vector<1x1x32xf32>
    %243 = vector.shape_cast %242 : vector<1x1x32xf32> to vector<1x32xf32>
    %c1_115 = arith.constant 1 : index
    %c0_116 = arith.constant 0 : index
    %c0_117 = arith.constant 0 : index
    %244 = vector.load %arg13[%c1_115, %c0_116, %c0_117] : memref<2x1x32xf32, #tpu.memory_space<vmem>>, vector<1x1x32xf32>
    %245 = vector.shape_cast %244 : vector<1x1x32xf32> to vector<1x32xf32>
    %cst_118 = arith.constant dense<0.000000e+00> : vector<16xf32>
    %246 = vector.multi_reduction <add>, %241, %cst_118 [1] : vector<16x32xf32> to vector<16xf32>
    %247 = vector.shape_cast %246 : vector<16xf32> to vector<16x1xf32>
    %cst_119 = arith.constant 3.200000e+01 : f32
    %248 = vector.broadcast %cst_119 : f32 to vector<16x1xf32>
    %249 = arith.divf %247, %248 : vector<16x1xf32>
    %250 = vector.broadcast %249 : vector<16x1xf32> to vector<16x32xf32>
    %251 = arith.subf %241, %250 : vector<16x32xf32>
    %252 = arith.mulf %251, %251 : vector<16x32xf32>
    %cst_120 = arith.constant dense<0.000000e+00> : vector<16xf32>
    %253 = vector.multi_reduction <add>, %252, %cst_120 [1] : vector<16x32xf32> to vector<16xf32>
    %254 = vector.shape_cast %253 : vector<16xf32> to vector<16x1xf32>
    %cst_121 = arith.constant 3.200000e+01 : f32
    %255 = vector.broadcast %cst_121 : f32 to vector<16x1xf32>
    %256 = arith.divf %254, %255 : vector<16x1xf32>
    %257 = vector.broadcast %249 : vector<16x1xf32> to vector<16x32xf32>
    %258 = arith.subf %241, %257 : vector<16x32xf32>
    %cst_122 = arith.constant 9.99999974E-6 : f32
    %259 = vector.broadcast %cst_122 : f32 to vector<16x1xf32>
    %260 = arith.addf %256, %259 : vector<16x1xf32>
    %261 = math.rsqrt %260 : vector<16x1xf32>
    %262 = vector.broadcast %261 : vector<16x1xf32> to vector<16x32xf32>
    %263 = arith.mulf %258, %262 : vector<16x32xf32>
    %264 = vector.broadcast %243 : vector<1x32xf32> to vector<16x32xf32>
    %265 = arith.mulf %263, %264 : vector<16x32xf32>
    %266 = vector.broadcast %245 : vector<1x32xf32> to vector<16x32xf32>
    %267 = arith.addf %265, %266 : vector<16x32xf32>
    %c0_123 = arith.constant 0 : index
    %c0_124 = arith.constant 0 : index
    %268 = vector.load %arg14[%c0_123, %c0_124] : memref<1x32xf32, #tpu.memory_space<vmem>>, vector<1x32xf32>
    %c0_125 = arith.constant 0 : index
    %c0_126 = arith.constant 0 : index
    %269 = vector.load %arg15[%c0_125, %c0_126] : memref<1x32xf32, #tpu.memory_space<vmem>>, vector<1x32xf32>
    %cst_127 = arith.constant dense<0.000000e+00> : vector<16xf32>
    %270 = vector.multi_reduction <add>, %267, %cst_127 [1] : vector<16x32xf32> to vector<16xf32>
    %271 = vector.shape_cast %270 : vector<16xf32> to vector<16x1xf32>
    %cst_128 = arith.constant 3.200000e+01 : f32
    %272 = vector.broadcast %cst_128 : f32 to vector<16x1xf32>
    %273 = arith.divf %271, %272 : vector<16x1xf32>
    %274 = vector.broadcast %273 : vector<16x1xf32> to vector<16x32xf32>
    %275 = arith.subf %267, %274 : vector<16x32xf32>
    %276 = arith.mulf %275, %275 : vector<16x32xf32>
    %cst_129 = arith.constant dense<0.000000e+00> : vector<16xf32>
    %277 = vector.multi_reduction <add>, %276, %cst_129 [1] : vector<16x32xf32> to vector<16xf32>
    %278 = vector.shape_cast %277 : vector<16xf32> to vector<16x1xf32>
    %cst_130 = arith.constant 3.200000e+01 : f32
    %279 = vector.broadcast %cst_130 : f32 to vector<16x1xf32>
    %280 = arith.divf %278, %279 : vector<16x1xf32>
    %281 = vector.broadcast %273 : vector<16x1xf32> to vector<16x32xf32>
    %282 = arith.subf %267, %281 : vector<16x32xf32>
    %cst_131 = arith.constant 9.99999974E-6 : f32
    %283 = vector.broadcast %cst_131 : f32 to vector<16x1xf32>
    %284 = arith.addf %280, %283 : vector<16x1xf32>
    %285 = math.rsqrt %284 : vector<16x1xf32>
    %286 = vector.broadcast %285 : vector<16x1xf32> to vector<16x32xf32>
    %287 = arith.mulf %282, %286 : vector<16x32xf32>
    %288 = vector.broadcast %268 : vector<1x32xf32> to vector<16x32xf32>
    %289 = arith.mulf %287, %288 : vector<16x32xf32>
    %290 = vector.broadcast %269 : vector<1x32xf32> to vector<16x32xf32>
    %291 = arith.addf %289, %290 : vector<16x32xf32>
    %c0_132 = arith.constant 0 : index
    %c0_133 = arith.constant 0 : index
    %292 = vector.load %arg16[%c0_132, %c0_133] : memref<16x32xf32, #tpu.memory_space<vmem>>, vector<16x32xf32>
    tpu.vector_store %arg16[%c0_132, %c0_133], %291 {strides = array<i32>} : memref<16x32xf32, #tpu.memory_space<vmem>>, vector<16x32xf32>,
    return
  }
}

</mosaic_0001>

<bundles_post_ra>
// kernel: agentformer_encoder.1
= control target key start
LH: loop header
LB: loop body
LE: loop exit
PB: predicated region body
PF: predicated region fallthrough
CT: control target
= control target key end

     0   :  { %s4196_s0 = inlined_call_operand.hbm [shape: f32[16,32], index: 0, kind: input, shape index: {}]   ;;  %s4197_s1 = inlined_call_operand.vmem [shape: f32[16,16], index: 1, kind: input, shape index: {}]   ;;  %s4198_s2 = inlined_call_operand.vmem [shape: f32[2,32,96], index: 2, kind: input, shape index: {}]   ;;  %s4199_s3 = inlined_call_operand.vmem [shape: f32[2,1,96], index: 3, kind: input, shape index: {}]   ;;  %s4200_s4 = inlined_call_operand.vmem [shape: f32[2,32,32], index: 4, kind: input, shape index: {}]   ;;  %s4201_s5 = inlined_call_operand.vmem [shape: f32[2,1,32], index: 5, kind: input, shape index: {}]   ;;  %s4202_s6 = inlined_call_operand.vmem [shape: f32[2,32,64], index: 6, kind: input, shape index: {}]   ;;  %s4203_s7 = inlined_call_operand.vmem [shape: f32[2,1,64], index: 7, kind: input, shape index: {}]   ;;  %s4204_s8 = inlined_call_operand.vmem [shape: f32[2,64,32], index: 8, kind: input, shape index: {}]   ;;  %s4205_s9 = inlined_call_operand.vmem [shape: f32[2,1,32], index: 9, kind: input, shape index: {}]   ;;  %s4206_s10 = inlined_call_operand.vmem [shape: f32[2,1,32], index: 10, kind: input, shape index: {}]   ;;  %s4207_s11 = inlined_call_operand.vmem [shape: f32[2,1,32], index: 11, kind: input, shape index: {}]   ;;  %s4208_s12 = inlined_call_operand.vmem [shape: f32[2,1,32], index: 12, kind: input, shape index: {}]   ;;  %s4209_s13 = inlined_call_operand.vmem [shape: f32[2,1,32], index: 13, kind: input, shape index: {}]   ;;  %s4210_s14 = inlined_call_operand.vmem [shape: f32[1,32], index: 14, kind: input, shape index: {}]   ;;  %s4211_s15 = inlined_call_operand.vmem [shape: f32[1,32], index: 15, kind: input, shape index: {}]   ;;  %s4212_s16 = inlined_call_operand.hbm [shape: f32[16,32], index: 16, kind: output, shape index: {}]  }
   0x1   :  { %4227 = sst [smem:[#allocation8_spill]] %s4196_s0 }
   0x2   :  { %21 = vsyncpa [#allocation3], 0 }
   0x3   :  { %22 = vsyncpa [#allocation4], 0  ;;  %s3592_s21 = smov [#allocation2]   ;;  %s4228_s25 = sld [smem:[#allocation8_spill]] }
   0x4   :  { %s28_s22 = sshll.u32 %s3592_s21, 4  ;;  %s29_s22 = int_to_ptr.vmem [resolvable:$true] %s28_s22 }
   0x9   :  { %s3544_s26 = scalar_lea.hbm %s4228_s25, 256 }
   0xa   :  { %p3545_p0 = scmp.ne.s32.totalorder %s4228_s25, %s3544_s26  ;;  %p3548_p1 = scmp.lt.u32.totalorder %s3544_s26, %s4228_s25 }
   0xc   :  { %p3550_p2 = pnand %p3548_p1, %p3545_p0 }
   0xe   :  { %3553 = shalt.err (!%p3550_p2)
}
   0xf   :  { %s3554_s0 = scalar_lea.vmem %s29_s22, 256  ;;  %p3559_p4 = scmp.lt.s32.totalorder %s29_s22, %s29_s22 }
  0x10   :  { %p3555_p3 = scmp.ne.s32.totalorder %s29_s22, %s3554_s0  ;;  %p3560_p5 = scmp.lt.s32.totalorder %s3554_s0, %s3554_s0 }
  0x12   :  { %p3561_p6 = por %p3560_p5, %p3559_p4 }
  0x14   :  { %p3562_p7 = pnand %p3561_p6, %p3555_p3 }
  0x16   :  { %3565 = shalt.err (!%p3562_p7)
}
  0x17   :  { %s4214_s17 = smov 128   ;;  %s4221_s18 = smov 8  }
  0x18   :  { %34 = dma.hbm_to_vmem [thread:$0]  %s4228_s25, 256, %s29_s22, [#allocation3], %s4214_s17, %s4214_s17, %s4221_s18  }
  0x19   :  { %3588 = dma.done.wait [#allocation3], 256  }
  0x1a   :  { %3589 = vsyncadd [#allocation3], 4294967040  ;;  %vm83_vm0 = vcmask 261120   ;;  %v72_v0 = vld [vmem:[%s4198_s2] sm:$0xff]  ;;  %v73_v1 = vld [vmem:[%s4198_s2 + $0x8] sm:$0xff]  ;;  %vm171_vm1 = vcmask 64512  }
  0x1b   :  { %v74_v2 = vld [vmem:[%s4198_s2 + $0x10] sm:$0xff]  ;;  %v3203_v3 = vpack.c.bf16 %v73_v1, %v72_v0  ;;  %v75_v4 = vld [vmem:[%s4198_s2 + $0x18] sm:$0xff]  ;;  %v3721_v5 = vld [vmem:[#allocation2] sm:$0xff]  ;;  %s3595_s0 = smov 80   ;;  %s3596_s19 = smov 96   ;;  %vm536_vm3 = vcmask 130048  }
  0x1c   :  { %v3207_v6 = vpack.c.bf16 %v75_v4, %v74_v2  ;;  %2995 = vmatprep.mubr.msk.f32.mxu1 %vm83_vm0, %v3721_v5  ;;  %v3725_v7 = vld [vmem:[#allocation2 + $0x8] sm:$0xff]  ;;  %v2757_v8 = vld [vmem:[%s4199_s3] ss:$0 sm:$0xff]  ;;  %s3597_s20 = smov 72   ;;  %s3598_s21 = smov 88   ;;  %vm3751_vm2 = vmpackc.low %vm171_vm1, %vm171_vm1  ;;  %vm1001_vm4 = vcmask 195584  }
  0x1d   :  { %3204 = vmatprep.subr.bf16.mxu1 %v3203_v3  ;;  %s3599_s23 = smov 120   ;;  %s3600_s24 = smov 112   ;;  %v3781_v37 = vld [vmem:[%s4197_s1 + $0x8] sm:$0xff]  ;;  %v3788_v42 = vld [vmem:[%s4197_s1] sm:$0xff]  ;;  %vm1252_vm5 = vcmask 523264  }
  0x1e   :  { %3206 = vmatpush3.bf16.msra.mxu1 %v3203_v3  ;;  %s4225_s26 = smov 104   ;;  %s4224_s1 = smov 64  }
  0x1f   :  { %3208 = vmatprep.subr.bf16.mxu1 %v3207_v6  ;;  %s4223_s22 = smov 48   ;;  %s4216_s25 = smov 56  }
  0x20   :  { %s4215_s27 = smov 40   ;;  %s4219_s17 = smov 16  }
  0x21   :  { %s4217_s30 = smov 24  }
  0x22   :  { %3210 = vmatpush3.bf16.msra.mxu1 %v3207_v6 }
  0x25   :  { %2996 = vmatmul.mubr.msk.f32.vlgmr.msra.gmra.mrb[0].mxu1 %vm83_vm0, %v3725_v7 }
  0xf8   :  { %v2997_v9 = vpop.f32.mrb[0].mxu1 }
  0xf9   :  { %v162_v10 = vadd.f32 %v2997_v9, %v2757_v8  ;;  %v156_v11 = vpop.f32.mrb[1].mxu1 }
  0xfa   :  { %v157_v12 = vadd.f32 %v2757_v8, %v156_v11 }
  0xfc   :  { %3002 = vmatprep.mubr.msk.f32.mxu1 %vm171_vm1, %v157_v12  ;;  %v3733_v13 = vpack.i.bf16 %v162_v10, %v157_v12 }
  0xfe   :  { %3391 = vrot.lane.b32.xlu1 %v3733_v13, %s3595_s0  ;;  %3381 = vrot.lane.b32.xlu0 %v3733_v13, %s3596_s19 }
 0x102   :  { %3396 = vrot.lane.b32.xlu1 %v3733_v13, %s3597_s20  ;;  %3386 = vrot.lane.b32.xlu0 %v3733_v13, %s3598_s21 }
 0x106   :  { %257 = vrot.lane.b32.xlu1 %v162_v10, %s3599_s23  ;;  %255 = vrot.lane.b32.xlu0 %v157_v12, %s3599_s23 }
 0x10a   :  { %348 = vrot.lane.b32.xlu1 %v162_v10, %s3600_s24  ;;  %346 = vrot.lane.b32.xlu0 %v157_v12, %s3600_s24 }
 0x10e   :  { %439 = vrot.lane.b32.xlu1 %v162_v10, %s4225_s26  ;;  %437 = vrot.lane.b32.xlu0 %v157_v12, %s4225_s26  ;;  %s3608_s26 = smov [#allocation5]  }
 0x170   :  { %v3392_v14 = vpop.permute.xlu1 %3391  ;;  %v3382_v15 = vpop.permute.xlu0 %3381 }
 0x171   :  { %v3394_v16 = vunpack.i.h.bf16 %v3392_v14  ;;  %v3393_v17 = vunpack.i.l.bf16 %v3392_v14  ;;  %v3384_v18 = vunpack.i.h.bf16 %v3382_v15  ;;  %v3383_v19 = vunpack.i.l.bf16 %v3382_v15 }
 0x173   :  { %v3211_v21 = vpack.c.bf16 %v3384_v18, %v3383_v19  ;;  %v3223_v22 = vpack.c.bf16 %v3394_v16, %v3393_v17 }
 0x174   :  { %v3397_v23 = vpop.permute.xlu1 %3396  ;;  %v3387_v24 = vpop.permute.xlu0 %3386 }
 0x175   :  { %v3399_v25 = vunpack.i.h.bf16 %v3397_v23  ;;  %v3398_v26 = vunpack.i.l.bf16 %v3397_v23  ;;  %v3389_v27 = vunpack.i.h.bf16 %v3387_v24  ;;  %v3388_v28 = vunpack.i.l.bf16 %v3387_v24  ;;  %3213 = vmatprep.subr.msk.bf16.mxu1 %vm3751_vm2, %v3211_v21 }
 0x176   :  { %3216 = vmatpush3.bf16.xpose.msk.msra.mxu1 %vm3751_vm2, %v3211_v21 }
 0x177   :  { %3225 = vmatprep.subr.msk.bf16.mxu1 %vm3751_vm2, %v3223_v22  ;;  %v3217_v29 = vpack.c.bf16 %v3389_v27, %v3388_v28  ;;  %v3229_v31 = vpack.c.bf16 %v3399_v25, %v3398_v26 }
 0x178   :  { %v256_v30 = vpop.permute.xlu0 %255  ;;  %v258_v32 = vpop.permute.xlu1 %257 }
 0x179   :  { %3219 = vmatprep.subr.msk.bf16.mxu0 %vm3751_vm2, %v3217_v29  ;;  %3009 = vmatprep.mubr.msk.f32.mxu0 %vm171_vm1, %v256_v30 }
 0x17a   :  { %3222 = vmatpush3.bf16.xpose.msk.msra.mxu0 %vm3751_vm2, %v3217_v29 }
 0x17b   :  { %3231 = vmatprep.subr.msk.bf16.mxu0 %vm3751_vm2, %v3229_v31 }
 0x17c   :  { %v347_v33 = vpop.permute.xlu0 %346  ;;  %v349_v35 = vpop.permute.xlu1 %348 }
 0x17d   :  { %3003 = vmatmul.mubr.msk.f32.vlgmr.msra.gmra.mrb[2].mxu1 %vm171_vm1, %v162_v10 }
 0x17e   :  { %3228 = vmatpush3.bf16.xpose.msk.msra.mxu1 %vm3751_vm2, %v3223_v22  ;;  %3016 = vmatprep.mubr.msk.f32.mxu1 %vm171_vm1, %v347_v33 }
 0x180   :  { %v438_v34 = vpop.permute.xlu0 %437  ;;  %v440_v36 = vpop.permute.xlu1 %439 }
 0x181   :  { %3010 = vmatmul.mubr.msk.f32.vlgmr.msra.gmra.mrb[0].mxu0 %vm171_vm1, %v258_v32 }
 0x182   :  { %3234 = vmatpush3.bf16.xpose.msk.msra.mxu0 %vm3751_vm2, %v3229_v31  ;;  %3023 = vmatprep.mubr.msk.f32.mxu0 %vm171_vm1, %v438_v34 }
 0x185   :  { %3017 = vmatmul.mubr.msk.f32.vlgmr.msra.gmra.mrb[4].mxu1 %vm171_vm1, %v349_v35 }
 0x189   :  { %3024 = vmatmul.mubr.msk.f32.vlgmr.msra.gmra.mrb[2].mxu0 %vm171_vm1, %v440_v36 }
 0x250   :  { %v3004_v38 = vpop.f32.mrb[2].mxu1 }
 0x251   :  { %v529_v39 = vadd.f32 %v3004_v38, %v3781_v37  ;;  %v246_v40 = vpop.f32.mrb[3].mxu1 }
 0x252   :  { %v528_v46 = vadd.f32 %v246_v40, %v3788_v42 }
 0x253   :  { %v540_v41 = vsel %vm536_vm3, %v529_v39, -inf }
 0x254   :  { %v3011_v43 = vpop.f32.mrb[0].mxu0  ;;  %541 = vmax.xlane.f32.xlu1 %v540_v41  ;;  %v537_v52 = vsel %vm536_vm3, %v528_v46, -inf }
 0x255   :  { %v531_v44 = vadd.f32 %v3011_v43, %v3781_v37  ;;  %v337_v45 = vpop.f32.mrb[1].mxu0 }
 0x256   :  { %v530_v51 = vadd.f32 %v337_v45, %v3788_v42 }
 0x257   :  { %v546_v47 = vsel %vm536_vm3, %v531_v44, -inf }
 0x258   :  { %547 = vmax.xlane.f32.xlu0 %v546_v47  ;;  %v3018_v48 = vpop.f32.mrb[4].mxu1  ;;  %v543_v58 = vsel %vm536_vm3, %v530_v51, -inf }
 0x259   :  { %v428_v49 = vpop.f32.mrb[5].mxu1  ;;  %v533_v57 = vadd.f32 %v3018_v48, %v3781_v37 }
 0x25a   :  { %v3794_v50 = vadd.f32 %v428_v49, %v3788_v42 }
 0x25b   :  { %v552_v61 = vsel %vm536_vm3, %v533_v57, -inf }
 0x25c   :  { %v3025_v53 = vpop.f32.mrb[2].mxu0  ;;  %538 = vmax.xlane.f32.xlu0 %v537_v52  ;;  %v549_v54 = vsel %vm536_vm3, %v3794_v50, -inf }
 0x25d   :  { %v519_v55 = vpop.f32.mrb[3].mxu0  ;;  %550 = vmax.xlane.f32.xlu1 %v549_v54  ;;  %v535_v60 = vadd.f32 %v3025_v53, %v3781_v37 }
 0x25e   :  { %v3801_v56 = vadd.f32 %v519_v55, %v3788_v42 }
 0x25f   :  { %v558_v62 = vsel %vm536_vm3, %v535_v60, -inf }
 0x260   :  { %544 = vmax.xlane.f32.xlu0 %v543_v58  ;;  %v555_v59 = vsel %vm536_vm3, %v3801_v56, -inf }
 0x261   :  { %556 = vmax.xlane.f32.xlu1 %v555_v59 }
 0x264   :  { %553 = vmax.xlane.f32.xlu0 %v552_v61 }
 0x268   :  { %559 = vmax.xlane.f32.xlu0 %v558_v62 }
 0x272   :  { %3401 = vrot.lane.b32.xlu1 %v3733_v13, %s4224_s1  ;;  %s2745_s1 = sshll.u32 %s3608_s26, 4  ;;  %s2746_s1 = int_to_ptr.vmem [resolvable:$true] %s2745_s1 }
 0x273   :  { %p3571_p9 = scmp.lt.s32.totalorder %s2746_s1, %s2746_s1 }
 0x2e1   :  { %v542_v63 = vpop.xlane.xlu1 %541 }
 0x2e2   :  { %v562_v0 = vsub.f32 %v529_v39, %v542_v63 }
 0x2e4   :  { %v571_v1 = vmul.f32 1.442695, %v562_v0 }
 0x2e5   :  { %v548_v2 = vpop.xlane.xlu0 %547 }
 0x2e6   :  { %3460 = vpow2.f32 %v571_v1  ;;  %v564_v3 = vsub.f32 %v531_v44, %v548_v2 }
 0x2e8   :  { %v575_v4 = vmul.f32 1.442695, %v564_v3 }
 0x2e9   :  { %v539_v6 = vpop.xlane.xlu0 %538 }
 0x2ea   :  { %3462 = vpow2.f32 %v575_v4  ;;  %v561_v8 = vsub.f32 %v528_v46, %v539_v6  ;;  %v551_v9 = vpop.xlane.xlu1 %550 }
 0x2eb   :  { %v565_v40 = vsub.f32 %v3794_v50, %v551_v9 }
 0x2ec   :  { %v569_v10 = vmul.f32 1.442695, %v561_v8 }
 0x2ed   :  { %v545_v11 = vpop.xlane.xlu0 %544  ;;  %v577_v41 = vmul.f32 1.442695, %v565_v40 }
 0x2ee   :  { %3464 = vpow2.f32 %v569_v10  ;;  %v563_v12 = vsub.f32 %v530_v51, %v545_v11  ;;  %v557_v14 = vpop.xlane.xlu1 %556 }
 0x2ef   :  { %v567_v43 = vsub.f32 %v3801_v56, %v557_v14 }
 0x2f0   :  { %v3812_v15 = vpop.eup %3460  ;;  %v573_v16 = vmul.f32 1.442695, %v563_v12 }
 0x2f1   :  { %v554_v17 = vpop.xlane.xlu0 %553  ;;  %v588_v18 = vsel %vm536_vm3, %v3812_v15, 0.0  ;;  %v581_v44 = vmul.f32 1.442695, %v567_v43 }
 0x2f2   :  { %3466 = vpow2.f32 %v573_v16  ;;  %v566_v19 = vsub.f32 %v533_v57, %v554_v17  ;;  %589 = vadd.xlane.f32.xlu0 %v588_v18  ;;  %v3402_v21 = vpop.permute.xlu1 %3401 }
 0x2f3   :  { %v3404_v22 = vunpack.i.h.bf16 %v3402_v21  ;;  %v3403_v23 = vunpack.i.l.bf16 %v3402_v21 }
 0x2f4   :  { %v3816_v24 = vpop.eup %3462  ;;  %v579_v25 = vmul.f32 1.442695, %v566_v19 }
 0x2f5   :  { %v3235_v26 = vpack.c.bf16 %v3404_v22, %v3403_v23  ;;  %v560_v27 = vpop.xlane.xlu0 %559  ;;  %v594_v28 = vsel %vm536_vm3, %v3816_v24, 0.0 }
 0x2f6   :  { %3468 = vpow2.f32 %v579_v25  ;;  %v568_v29 = vsub.f32 %v535_v60, %v560_v27  ;;  %595 = vadd.xlane.f32.xlu0 %v594_v28  ;;  %v1005_v25 = vld [vmem:[%s4200_s4 + $0x8] sm:$0xff] }
 0x2f7   :  { %3236 = vmatprep.subr.bf16.mxu1 %v3235_v26 }
 0x2f8   :  { %v3465_v30 = vpop.eup %3464  ;;  %v583_v31 = vmul.f32 1.442695, %v568_v29  ;;  %3238 = vmatpush3.bf16.msra.mxu1 %v3235_v26 }
 0x2f9   :  { %v585_v32 = vsel %vm536_vm3, %v3465_v30, 0.0 }
 0x2fa   :  { %3470 = vpow2.f32 %v583_v31  ;;  %586 = vadd.xlane.f32.xlu1 %v585_v32  ;;  %v1006_v31 = vld [vmem:[%s4200_s4 + $0x10] sm:$0xff]  ;;  %v1007_v32 = vld [vmem:[%s4200_s4 + $0x18] sm:$0xff] }
 0x2fb   :  { %3472 = vpow2.f32 %v577_v41 }
 0x2fc   :  { %v3467_v33 = vpop.eup %3466  ;;  %3474 = vpow2.f32 %v581_v44 }
 0x2fd   :  { %v591_v34 = vsel %vm536_vm3, %v3467_v33, 0.0 }
 0x2fe   :  { %592 = vadd.xlane.f32.xlu1 %v591_v34 }
 0x300   :  { %v3822_v35 = vpop.eup %3468 }
 0x301   :  { %v600_v36 = vsel %vm536_vm3, %v3822_v35, 0.0 }
 0x302   :  { %601 = vadd.xlane.f32.xlu0 %v600_v36 }
 0x304   :  { %v3826_v38 = vpop.eup %3470 }
 0x305   :  { %v606_v39 = vsel %vm536_vm3, %v3826_v38, 0.0  ;;  %v3473_v45 = vpop.eup %3472 }
 0x306   :  { %607 = vadd.xlane.f32.xlu0 %v606_v39  ;;  %v597_v46 = vsel %vm536_vm3, %v3473_v45, 0.0  ;;  %v3475_v47 = vpop.eup %3474 }
 0x307   :  { %v603_v48 = vsel %vm536_vm3, %v3475_v47, 0.0 }
 0x30f   :  { %3411 = vrot.lane.b32.xlu1 %v3733_v13, %s4223_s22  ;;  %s4236_s22 = smov 8  }
 0x31c   :  { %3406 = vrot.lane.b32.xlu0 %v3733_v13, %s4216_s25  ;;  %s4238_s25 = smov 24  }
 0x333   :  { %598 = vadd.xlane.f32.xlu1 %v597_v46 }
 0x337   :  { %604 = vadd.xlane.f32.xlu1 %v603_v48 }
 0x348   :  { %3416 = vrot.lane.b32.xlu1 %v3733_v13, %s4215_s27 }
 0x37f   :  { %v590_v49 = vpop.xlane.xlu0 %589 }
 0x380   :  { %3476 = vrcp.f32 %v590_v49 }
 0x383   :  { %v596_v51 = vpop.xlane.xlu0 %595 }
 0x387   :  { %v587_v50 = vpop.xlane.xlu1 %586 }
 0x388   :  { %3478 = vrcp.f32 %v587_v50 }
 0x38a   :  { %v3477_v57 = vpop.eup %3476 }
 0x38b   :  { %v593_v52 = vpop.xlane.xlu1 %592  ;;  %v612_v62 = vmul.f32 %v3477_v57, %v3812_v15 }
 0x38c   :  { %3480 = vrcp.f32 %v593_v52  ;;  %v2784_v52 = vld [vmem:[%s4201_s5] ss:$0 sm:$0xff] }
 0x38d   :  { %3482 = vrcp.f32 %v596_v51 }
 0x38f   :  { %v602_v53 = vpop.xlane.xlu0 %601  ;;  %v3412_v54 = vpop.permute.xlu1 %3411 }
 0x390   :  { %v3414_v55 = vunpack.i.h.bf16 %v3412_v54  ;;  %v3413_v56 = vunpack.i.l.bf16 %v3412_v54  ;;  %3484 = vrcp.f32 %v602_v53 }
 0x392   :  { %v3479_v58 = vpop.eup %3478  ;;  %v3243_v59 = vpack.c.bf16 %v3414_v55, %v3413_v56 }
 0x393   :  { %v608_v60 = vpop.xlane.xlu0 %607  ;;  %v610_v61 = vmul.f32 %v3479_v58, %v3465_v30 }
 0x394   :  { %3244 = vmatprep.subr.bf16.mxu0 %v3243_v59 }
 0x395   :  { %3030 = vmatprep.mubr.msk.f32.mxu1 %vm536_vm3, %v610_v61  ;;  %3246 = vmatpush3.bf16.msra.mxu0 %v3243_v59 }
 0x396   :  { %v3481_v13 = vpop.eup %3480  ;;  %3031 = vmatmul.mubr.msk.f32.vlgmr.msra.gmra.mrb[6].mxu1 %vm536_vm3, %v612_v62 }
 0x397   :  { %v3407_v63 = vpop.permute.xlu0 %3406  ;;  %v614_v0 = vmul.f32 %v3481_v13, %v3467_v33  ;;  %v3483_v4 = vpop.eup %3482  ;;  %v3255_v33 = vpack.c.bf16 %v1007_v32, %v1006_v31  ;;  %v2788_v32 = vld [vmem:[%s4207_s11] ss:$0 sm:$0xff] }
 0x398   :  { %v3409_v1 = vunpack.i.h.bf16 %v3407_v63  ;;  %v3408_v2 = vunpack.i.l.bf16 %v3407_v63  ;;  %v616_v6 = vmul.f32 %v3483_v4, %v3816_v24  ;;  %v1004_v24 = vld [vmem:[%s4200_s4] sm:$0xff] }
 0x399   :  { %3037 = vmatprep.mubr.msk.f32.mxu1 %vm536_vm3, %v614_v0  ;;  %v3251_v27 = vpack.c.bf16 %v1005_v25, %v1004_v24 }
 0x39a   :  { %v3239_v3 = vpack.c.bf16 %v3409_v1, %v3408_v2  ;;  %v3485_v14 = vpop.eup %3484 }
 0x39b   :  { %v620_v18 = vmul.f32 %v3485_v14, %v3822_v35  ;;  %3252 = vmatprep.subr.bf16.mxu0 %v3251_v27  ;;  %v1238_v14 = vld [vmem:[%s4204_s8 + $0x8] sm:$0xff] }
 0x39c   :  { %3240 = vmatprep.subr.bf16.mxu1 %v3239_v3 }
 0x39d   :  { %3242 = vmatpush3.bf16.msra.mxu1 %v3239_v3 }
 0x3a0   :  { %3038 = vmatmul.mubr.msk.f32.vlgmr.msra.gmra.mrb[8].mxu1 %vm536_vm3, %v616_v6  ;;  %v1144_v6 = vld [vmem:[%s4202_s6 + $0x8] sm:$0xff] }
 0x3c0   :  { %v599_v8 = vpop.xlane.xlu1 %598 }
 0x3c1   :  { %3486 = vrcp.f32 %v599_v8 }
 0x3c2   :  { %3488 = vrcp.f32 %v608_v60 }
 0x3c4   :  { %v605_v9 = vpop.xlane.xlu1 %604 }
 0x3c5   :  { %3490 = vrcp.f32 %v605_v9  ;;  %v1145_v9 = vld [vmem:[%s4202_s6 + $0x10] sm:$0xff] }
 0x3c8   :  { %v3417_v10 = vpop.permute.xlu1 %3416 }
 0x3c9   :  { %v3419_v11 = vunpack.i.h.bf16 %v3417_v10  ;;  %v3418_v12 = vunpack.i.l.bf16 %v3417_v10  ;;  %v1146_v10 = vld [vmem:[%s4202_s6 + $0x18] sm:$0xff] }
 0x3cb   :  { %v3487_v15 = vpop.eup %3486  ;;  %v3247_v16 = vpack.c.bf16 %v3419_v11, %v3418_v12  ;;  %v3263_v11 = vpack.c.bf16 %v1146_v10, %v1145_v9  ;;  %v1237_v12 = vld [vmem:[%s4204_s8] sm:$0xff]  ;;  %v2800_v9 = vld [vmem:[%s4198_s2 + $0x38] sm:$0xff] }
 0x3cc   :  { %v618_v17 = vmul.f32 %v3487_v15, %v3473_v45  ;;  %v3489_v19 = vpop.eup %3488  ;;  %v1239_v15 = vld [vmem:[%s4204_s8 + $0x10] sm:$0xff] }
 0x3cd   :  { %3248 = vmatprep.subr.bf16.mxu1 %v3247_v16  ;;  %v624_v23 = vmul.f32 %v3489_v19, %v3826_v38  ;;  %v1241_v19 = vld [vmem:[%s4204_s8 + $0x20] sm:$0xff] }
 0x3ce   :  { %3044 = vmatprep.mubr.msk.f32.mxu0 %vm536_vm3, %v618_v17  ;;  %3250 = vmatpush3.bf16.msra.mxu1 %v3247_v16  ;;  %v3267_v16 = vpack.c.bf16 %v1238_v14, %v1237_v12  ;;  %v1240_v17 = vld [vmem:[%s4204_s8 + $0x18] sm:$0xff] }
 0x3cf   :  { %v3491_v21 = vpop.eup %3490  ;;  %3045 = vmatmul.mubr.msk.f32.vlgmr.msra.gmra.mrb[4].mxu0 %vm536_vm3, %v620_v18  ;;  %v3271_v18 = vpack.c.bf16 %v1240_v17, %v1239_v15 }
 0x3d0   :  { %v622_v22 = vmul.f32 %v3491_v21, %v3475_v47  ;;  %3254 = vmatpush3.bf16.msra.mxu0 %v3251_v27  ;;  %v1242_v21 = vld [vmem:[%s4204_s8 + $0x28] sm:$0xff] }
 0x3d1   :  { %3256 = vmatprep.subr.bf16.mxu0 %v3255_v33 }
 0x3d2   :  { %3051 = vmatprep.mubr.msk.f32.mxu1 %vm536_vm3, %v622_v22  ;;  %v3275_v22 = vpack.c.bf16 %v1242_v21, %v1241_v19  ;;  %v2795_v19 = vld [vmem:[%s4208_s12] ss:$0 sm:$0xff] }
 0x3d3   :  { %3052 = vmatmul.mubr.msk.f32.vlgmr.msra.gmra.mrb[10].mxu1 %vm536_vm3, %v624_v23 }
 0x3d4   :  { %3258 = vmatpush3.bf16.msra.mxu0 %v3255_v33 }
 0x3d5   :  { %3268 = vmatprep.subr.bf16.mxu0 %v3267_v16 }
 0x469   :  { %v3032_v26 = vpop.f32.mrb[6].mxu1 }
 0x46a   :  { %v703_v28 = vpop.f32.mrb[7].mxu1 }
 0x473   :  { %v3039_v29 = vpop.f32.mrb[8].mxu1 }
 0x474   :  { %977 = vrot.lane.b32.xlu1 %v3039_v29, %s4221_s18  ;;  %v790_v30 = vpop.f32.mrb[9].mxu1 }
 0x475   :  { %975 = vrot.lane.b32.xlu0 %v790_v30, %s4221_s18  ;;  %v2787_v30 = vld [vmem:[%s4206_s10] ss:$0 sm:$0xff] }
 0x4a2   :  { %v3046_v34 = vpop.f32.mrb[4].mxu0 }
 0x4a3   :  { %v877_v35 = vpop.f32.mrb[5].mxu0  ;;  %985 = vrot.lane.b32.xlu1 %v3046_v34, %s4219_s17 }
 0x4a4   :  { %983 = vrot.lane.b32.xlu0 %v877_v35, %s4219_s17 }
 0x4a6   :  { %v3053_v36 = vpop.f32.mrb[10].mxu1 }
 0x4a7   :  { %993 = vrot.lane.b32.xlu1 %v3053_v36, %s4217_s30  ;;  %v964_v38 = vpop.f32.mrb[11].mxu1 }
 0x4a8   :  { %991 = vrot.lane.b32.xlu0 %v964_v38, %s4217_s30 }
 0x4e6   :  { %v978_v39 = vpop.permute.xlu1 %977 }
 0x4e7   :  { %v976_v40 = vpop.permute.xlu0 %975  ;;  %v998_v46 = vsel %vm171_vm1, %v3032_v26, %v978_v39 }
 0x4e8   :  { %v997_v44 = vsel %vm171_vm1, %v703_v28, %v976_v40  ;;  %v1243_v40 = vld [vmem:[%s4204_s8 + $0x30] sm:$0xff] }
 0x515   :  { %v986_v41 = vpop.permute.xlu1 %985 }
 0x516   :  { %v984_v43 = vpop.permute.xlu0 %983  ;;  %v1000_v49 = vsel %vm536_vm3, %v998_v46, %v986_v41  ;;  %v1244_v41 = vld [vmem:[%s4204_s8 + $0x38] sm:$0xff] }
 0x517   :  { %v999_v47 = vsel %vm536_vm3, %v997_v44, %v984_v43  ;;  %v3279_v43 = vpack.c.bf16 %v1244_v41, %v1243_v40  ;;  %v2789_v44 = vld [vmem:[%s4203_s7] ss:$0 sm:$0xff] }
 0x519   :  { %v994_v45 = vpop.permute.xlu1 %993 }
 0x51a   :  { %v992_v48 = vpop.permute.xlu0 %991  ;;  %v1003_v51 = vsel %vm1001_vm4, %v1000_v49, %v994_v45 }
 0x51b   :  { %v1002_v50 = vsel %vm1001_vm4, %v999_v47, %v992_v48 }
 0x51c   :  { %3062 = vmatprep.mubr.msk.f32.mxu0 %vm83_vm0, %v1002_v50 }
 0x51d   :  { %3063 = vmatmul.mubr.msk.f32.vlgmr.msra.gmra.mrb[6].mxu0 %vm83_vm0, %v1003_v51  ;;  %v2792_v51 = vld [vmem:[%s4205_s9] ss:$0 sm:$0xff] }
 0x51e   :  { %3270 = vmatpush3.bf16.msra.mxu0 %v3267_v16 }
 0x51f   :  { %3272 = vmatprep.subr.bf16.mxu0 %v3271_v18 }
 0x522   :  { %3274 = vmatpush3.bf16.msra.mxu0 %v3271_v18 }
 0x523   :  { %3276 = vmatprep.subr.bf16.mxu0 %v3275_v22 }
 0x526   :  { %3278 = vmatpush3.bf16.msra.mxu0 %v3275_v22 }
 0x527   :  { %3280 = vmatprep.subr.bf16.mxu0 %v3279_v43 }
 0x52a   :  { %3282 = vmatpush3.bf16.msra.mxu0 %v3279_v43 }
 0x5f0   :  { %v3064_v53 = vpop.f32.mrb[6].mxu0 }
 0x5f1   :  { %v1093_v54 = vadd.f32 %v3064_v53, %v2784_v52  ;;  %v1087_v55 = vpop.f32.mrb[7].mxu0 }
 0x5f2   :  { %v1088_v56 = vadd.f32 %v2784_v52, %v1087_v55 }
 0x5f3   :  { %v1097_v57 = vadd.f32 %v1093_v54, %v3725_v7 }
 0x5f4   :  { %v1096_v58 = vadd.f32 %v1088_v56, %v3721_v5  ;;  %v1143_v5 = vld [vmem:[%s4202_s6] sm:$0xff] }
 0x5f5   :  { %v1103_v59 = vsel %vm83_vm0, %v1097_v57, 0.0  ;;  %v3259_v8 = vpack.c.bf16 %v1144_v6, %v1143_v5  ;;  %v2798_v5 = vld [vmem:[%s4198_s2 + $0x28] sm:$0xff] }
 0x5f6   :  { %1104 = vadd.xlane.f32.xlu1 %v1103_v59  ;;  %v1100_v60 = vsel %vm83_vm0, %v1096_v58, 0.0 }
 0x5f7   :  { %1101 = vadd.xlane.f32.xlu0 %v1100_v60  ;;  %3260 = vmatprep.subr.bf16.mxu1 %v3259_v8 }
 0x5f8   :  { %3262 = vmatpush3.bf16.msra.mxu1 %v3259_v8  ;;  %v2799_v8 = vld [vmem:[%s4198_s2 + $0x30] sm:$0xff] }
 0x5f9   :  { %3264 = vmatprep.subr.bf16.mxu1 %v3263_v11  ;;  %v3287_v10 = vpack.c.bf16 %v2800_v9, %v2799_v8 }
 0x5fc   :  { %3266 = vmatpush3.bf16.msra.mxu1 %v3263_v11 }
 0x683   :  { %v1105_v61 = vpop.xlane.xlu1 %1104 }
 0x684   :  { %v1108_v62 = vmul.f32 0.03125, %v1105_v61  ;;  %v1102_v13 = vpop.xlane.xlu0 %1101 }
 0x685   :  { %v1107_v63 = vmul.f32 0.03125, %v1102_v13 }
 0x686   :  { %v1110_v0 = vsub.f32 %v1097_v57, %v1108_v62 }
 0x687   :  { %v1109_v1 = vsub.f32 %v1096_v58, %v1107_v63 }
 0x688   :  { %v1112_v4 = vmul.f32 %v1110_v0, %v1110_v0 }
 0x689   :  { %v1111_v2 = vmul.f32 %v1109_v1, %v1109_v1 }
 0x68a   :  { %v1116_v7 = vsel %vm83_vm0, %v1112_v4, 0.0 }
 0x68b   :  { %v1113_v3 = vsel %vm83_vm0, %v1111_v2, 0.0 }
 0x68c   :  { %1114 = vadd.xlane.f32.xlu0 %v1113_v3 }
 0x690   :  { %1117 = vadd.xlane.f32.xlu0 %v1116_v7  ;;  %v2797_v7 = vld [vmem:[%s4198_s2 + $0x20] sm:$0xff]  ;;  %s4237_s2 = smov 16  }
 0x691   :  { %v3283_v6 = vpack.c.bf16 %v2798_v5, %v2797_v7 }
 0x693   :  { %3284 = vmatprep.subr.bf16.mxu1 %v3283_v6 }
 0x719   :  { %v1115_v23 = vpop.xlane.xlu0 %1114 }
 0x71a   :  { %v1119_v24 = vmul.f32 0.03125, %v1115_v23 }
 0x71c   :  { %v1121_v25 = vadd.f32 1e-05, %v1119_v24  ;;  %v2796_v24 = vld [vmem:[%s4209_s13] ss:$0 sm:$0xff] }
 0x71d   :  { %v1118_v26 = vpop.xlane.xlu0 %1117 }
 0x71e   :  { %3492 = vrsqrt.f32 %v1121_v25  ;;  %v1120_v27 = vmul.f32 0.03125, %v1118_v26 }
 0x720   :  { %v1122_v28 = vadd.f32 1e-05, %v1120_v27 }
 0x722   :  { %3494 = vrsqrt.f32 %v1122_v28 }
 0x728   :  { %v3493_v29 = vpop.eup %3492 }
 0x729   :  { %v1125_v31 = vmul.f32 %v3493_v29, %v1109_v1  ;;  %v2802_v29 = vld [vmem:[%s4199_s3 + $0x1] ss:$0 sm:$0xff]  ;;  %s4231_s3 = smov 104  }
 0x72b   :  { %v1133_v33 = vmul.f32 %v2787_v30, %v1125_v31 }
 0x72c   :  { %v3495_v34 = vpop.eup %3494 }
 0x72d   :  { %v1126_v35 = vmul.f32 %v3495_v34, %v1110_v0  ;;  %v1141_v36 = vadd.f32 %v2788_v32, %v1133_v33 }
 0x72f   :  { %v1134_v38 = vmul.f32 %v2787_v30, %v1126_v35  ;;  %3073 = vmatprep.mubr.msk.f32.mxu1 %vm83_vm0, %v1141_v36 }
 0x731   :  { %v1142_v39 = vadd.f32 %v2788_v32, %v1134_v38 }
 0x733   :  { %3074 = vmatmul.mubr.msk.f32.vlgmr.msra.gmra.mrb[12].mxu1 %vm83_vm0, %v1142_v39 }
 0x734   :  { %3286 = vmatpush3.bf16.msra.mxu1 %v3283_v6 }
 0x735   :  { %3288 = vmatprep.subr.bf16.mxu1 %v3287_v10 }
 0x738   :  { %3290 = vmatpush3.bf16.msra.mxu1 %v3287_v10 }
 0x806   :  { %v3075_v45 = vpop.f32.mrb[12].mxu1 }
 0x807   :  { %v1232_v46 = vadd.f32 %v3075_v45, %v2789_v44  ;;  %v1226_v47 = vpop.f32.mrb[13].mxu1 }
 0x808   :  { %v1227_v48 = vadd.f32 %v2789_v44, %v1226_v47 }
 0x809   :  { %v1236_v50 = vmax.f32 %v1232_v46, 0.0 }
 0x80a   :  { %v1235_v49 = vmax.f32 %v1227_v48, 0.0 }
 0x80c   :  { %3092 = vmatprep.mubr.msk.f32.mxu0 %vm1252_vm5, %v1235_v49 }
 0x80d   :  { %3093 = vmatmul.mubr.msk.f32.vlgmr.msra.gmra.mrb[8].mxu0 %vm1252_vm5, %v1236_v50 }
 0x8e0   :  { %v3094_v52 = vpop.f32.mrb[8].mxu0 }
 0x8e1   :  { %v1331_v53 = vadd.f32 %v3094_v52, %v2792_v51  ;;  %v1325_v54 = vpop.f32.mrb[9].mxu0 }
 0x8e2   :  { %v1326_v55 = vadd.f32 %v2792_v51, %v1325_v54 }
 0x8e3   :  { %v1335_v56 = vadd.f32 %v1331_v53, %v1142_v39 }
 0x8e4   :  { %v1334_v57 = vadd.f32 %v1326_v55, %v1141_v36 }
 0x8e5   :  { %v1341_v58 = vsel %vm83_vm0, %v1335_v56, 0.0 }
 0x8e6   :  { %1342 = vadd.xlane.f32.xlu0 %v1341_v58  ;;  %v1338_v59 = vsel %vm83_vm0, %v1334_v57, 0.0 }
 0x8e7   :  { %1339 = vadd.xlane.f32.xlu1 %v1338_v59 }
 0x973   :  { %v1343_v60 = vpop.xlane.xlu0 %1342 }
 0x974   :  { %v1345_v61 = vmul.f32 0.03125, %v1343_v60  ;;  %v1340_v62 = vpop.xlane.xlu1 %1339 }
 0x975   :  { %v1344_v13 = vmul.f32 0.03125, %v1340_v62 }
 0x976   :  { %v1347_v63 = vsub.f32 %v1335_v56, %v1345_v61 }
 0x977   :  { %v1346_v0 = vsub.f32 %v1334_v57, %v1344_v13 }
 0x978   :  { %v1349_v1 = vmul.f32 %v1347_v63, %v1347_v63 }
 0x979   :  { %v1348_v2 = vmul.f32 %v1346_v0, %v1346_v0 }
 0x97a   :  { %v1353_v3 = vsel %vm83_vm0, %v1349_v1, 0.0 }
 0x97b   :  { %1354 = vadd.xlane.f32.xlu0 %v1353_v3  ;;  %v1350_v4 = vsel %vm83_vm0, %v1348_v2, 0.0 }
 0x97c   :  { %1351 = vadd.xlane.f32.xlu1 %v1350_v4 }
 0xa08   :  { %v1355_v11 = vpop.xlane.xlu0 %1354 }
 0xa09   :  { %v1357_v12 = vmul.f32 0.03125, %v1355_v11  ;;  %v1352_v14 = vpop.xlane.xlu1 %1351 }
 0xa0a   :  { %v1356_v15 = vmul.f32 0.03125, %v1352_v14 }
 0xa0b   :  { %v1359_v16 = vadd.f32 1e-05, %v1357_v12 }
 0xa0c   :  { %v1358_v17 = vadd.f32 1e-05, %v1356_v15 }
 0xa0d   :  { %3496 = vrsqrt.f32 %v1359_v16 }
 0xa0e   :  { %3498 = vrsqrt.f32 %v1358_v17 }
 0xa17   :  { %v3497_v18 = vpop.eup %3496 }
 0xa18   :  { %v3499_v21 = vpop.eup %3498  ;;  %v1363_v22 = vmul.f32 %v3497_v18, %v1347_v63 }
 0xa19   :  { %v1362_v23 = vmul.f32 %v3499_v21, %v1346_v0 }
 0xa1a   :  { %v1371_v25 = vmul.f32 %v2795_v19, %v1363_v22 }
 0xa1b   :  { %v1370_v26 = vmul.f32 %v2795_v19, %v1362_v23 }
 0xa1c   :  { %v3963_v28 = vadd.f32 %v2796_v24, %v1371_v25 }
 0xa1d   :  { %v3961_v27 = vadd.f32 %v2796_v24, %v1370_v26 }
 0xa1f   :  { %3103 = vmatprep.mubr.msk.f32.mxu1 %vm83_vm0, %v3961_v27 }
 0xa20   :  { %3104 = vmatmul.mubr.msk.f32.vlgmr.msra.gmra.mrb[14].mxu1 %vm83_vm0, %v3963_v28 }
 0xaf3   :  { %v3105_v30 = vpop.f32.mrb[14].mxu1 }
 0xaf4   :  { %v1471_v31 = vadd.f32 %v3105_v30, %v2802_v29  ;;  %v1465_v32 = vpop.f32.mrb[15].mxu1 }
 0xaf5   :  { %v1466_v33 = vadd.f32 %v2802_v29, %v1465_v32 }
 0xaf7   :  { %3110 = vmatprep.mubr.msk.f32.mxu1 %vm171_vm1, %v1466_v33  ;;  %v3973_v34 = vpack.i.bf16 %v1471_v31, %v1466_v33 }
 0xaf9   :  { %3426 = vrot.lane.b32.xlu0 %v3973_v34, %s3598_s21  ;;  %3421 = vrot.lane.b32.xlu1 %v3973_v34, %s3596_s19  ;;  %s4233_s19 = smov 48   ;;  %s4235_s21 = smov 40  }
 0xafd   :  { %1563 = vrot.lane.b32.xlu0 %v1466_v33, %s3599_s23  ;;  %3431 = vrot.lane.b32.xlu1 %v3973_v34, %s3595_s0  ;;  %s4232_s0 = smov 64  }
 0xb01   :  { %1654 = vrot.lane.b32.xlu0 %v1466_v33, %s3600_s24  ;;  %3436 = vrot.lane.b32.xlu1 %v3973_v34, %s3597_s20  ;;  %s4234_s20 = smov 56  }
 0xb05   :  { %1745 = vrot.lane.b32.xlu0 %v1466_v33, %s4231_s3  ;;  %1565 = vrot.lane.b32.xlu1 %v1471_v31, %s3599_s23 }
 0xb09   :  { %1656 = vrot.lane.b32.xlu1 %v1471_v31, %s3600_s24 }
 0xb0d   :  { %1747 = vrot.lane.b32.xlu1 %v1471_v31, %s4231_s3 }
 0xb6b   :  { %v3427_v35 = vpop.permute.xlu0 %3426  ;;  %v3422_v36 = vpop.permute.xlu1 %3421 }
 0xb6c   :  { %v3429_v38 = vunpack.i.h.bf16 %v3427_v35  ;;  %v3428_v39 = vunpack.i.l.bf16 %v3427_v35  ;;  %v3424_v40 = vunpack.i.h.bf16 %v3422_v36  ;;  %v3423_v41 = vunpack.i.l.bf16 %v3422_v36 }
 0xb6e   :  { %v3297_v43 = vpack.c.bf16 %v3429_v38, %v3428_v39  ;;  %v3291_v44 = vpack.c.bf16 %v3424_v40, %v3423_v41 }
 0xb6f   :  { %v1564_v45 = vpop.permute.xlu0 %1563  ;;  %v3432_v46 = vpop.permute.xlu1 %3431 }
 0xb70   :  { %v3434_v47 = vunpack.i.h.bf16 %v3432_v46  ;;  %v3433_v48 = vunpack.i.l.bf16 %v3432_v46  ;;  %3293 = vmatprep.subr.msk.bf16.mxu1 %vm3751_vm2, %v3291_v44  ;;  %3299 = vmatprep.subr.msk.bf16.mxu0 %vm3751_vm2, %v3297_v43 }
 0xb71   :  { %3117 = vmatprep.mubr.msk.f32.mxu0 %vm171_vm1, %v1564_v45  ;;  %3296 = vmatpush3.bf16.xpose.msk.msra.mxu1 %vm3751_vm2, %v3291_v44 }
 0xb72   :  { %v3303_v49 = vpack.c.bf16 %v3434_v47, %v3433_v48  ;;  %3302 = vmatpush3.bf16.xpose.msk.msra.mxu0 %vm3751_vm2, %v3297_v43 }
 0xb73   :  { %v1655_v50 = vpop.permute.xlu0 %1654  ;;  %v3437_v51 = vpop.permute.xlu1 %3436 }
 0xb74   :  { %v3439_v52 = vunpack.i.h.bf16 %v3437_v51  ;;  %v3438_v53 = vunpack.i.l.bf16 %v3437_v51  ;;  %3305 = vmatprep.subr.msk.bf16.mxu1 %vm3751_vm2, %v3303_v49 }
 0xb76   :  { %v3309_v54 = vpack.c.bf16 %v3439_v52, %v3438_v53 }
 0xb77   :  { %v1566_v55 = vpop.permute.xlu1 %1565  ;;  %v1746_v56 = vpop.permute.xlu0 %1745 }
 0xb78   :  { %3111 = vmatmul.mubr.msk.f32.vlgmr.msra.gmra.mrb[16].mxu1 %vm171_vm1, %v1471_v31  ;;  %3311 = vmatprep.subr.msk.bf16.mxu0 %vm3751_vm2, %v3309_v54 }
 0xb79   :  { %3118 = vmatmul.mubr.msk.f32.vlgmr.msra.gmra.mrb[10].mxu0 %vm171_vm1, %v1566_v55  ;;  %3308 = vmatpush3.bf16.xpose.msk.msra.mxu1 %vm3751_vm2, %v3303_v49 }
 0xb7a   :  { %3124 = vmatprep.mubr.msk.f32.mxu1 %vm171_vm1, %v1655_v50  ;;  %3314 = vmatpush3.bf16.xpose.msk.msra.mxu0 %vm3751_vm2, %v3309_v54 }
 0xb7b   :  { %3131 = vmatprep.mubr.msk.f32.mxu0 %vm171_vm1, %v1746_v56  ;;  %v1657_v57 = vpop.permute.xlu1 %1656 }
 0xb7f   :  { %v1748_v58 = vpop.permute.xlu1 %1747 }
 0xb80   :  { %3125 = vmatmul.mubr.msk.f32.vlgmr.msra.gmra.mrb[18].mxu1 %vm171_vm1, %v1657_v57 }
 0xb81   :  { %3132 = vmatmul.mubr.msk.f32.vlgmr.msra.gmra.mrb[12].mxu0 %vm171_vm1, %v1748_v58 }
 0xc4b   :  { %v3112_v59 = vpop.f32.mrb[16].mxu1 }
 0xc4c   :  { %v1837_v60 = vadd.f32 %v3112_v59, %v3781_v37  ;;  %v3119_v61 = vpop.f32.mrb[10].mxu0  ;;  %v1554_v62 = vpop.f32.mrb[17].mxu1 }
 0xc4d   :  { %v1839_v13 = vadd.f32 %v3119_v61, %v3781_v37  ;;  %v1645_v63 = vpop.f32.mrb[11].mxu0  ;;  %v1836_v20 = vadd.f32 %v1554_v62, %v3788_v42 }
 0xc4e   :  { %v1847_v0 = vsel %vm536_vm3, %v1837_v60, -inf  ;;  %v1838_v2 = vadd.f32 %v1645_v63, %v3788_v42 }
 0xc4f   :  { %v1853_v1 = vsel %vm536_vm3, %v1839_v13, -inf  ;;  %1848 = vmax.xlane.f32.xlu1 %v1847_v0  ;;  %v1844_v3 = vsel %vm536_vm3, %v1836_v20, -inf }
 0xc50   :  { %1854 = vmax.xlane.f32.xlu0 %v1853_v1  ;;  %v1850_v11 = vsel %vm536_vm3, %v1838_v2, -inf }
 0xc53   :  { %v3126_v4 = vpop.f32.mrb[18].mxu1 }
 0xc54   :  { %v3133_v7 = vpop.f32.mrb[12].mxu0  ;;  %1845 = vmax.xlane.f32.xlu0 %v1844_v3  ;;  %v1736_v5 = vpop.f32.mrb[19].mxu1  ;;  %v1841_v9 = vadd.f32 %v3126_v4, %v3781_v37 }
 0xc55   :  { %v4020_v6 = vadd.f32 %v1736_v5, %v3788_v42  ;;  %v1827_v8 = vpop.f32.mrb[13].mxu0  ;;  %v1843_v14 = vadd.f32 %v3133_v7, %v3781_v37 }
 0xc56   :  { %v4024_v10 = vadd.f32 %v1827_v8, %v3788_v42  ;;  %v1859_v15 = vsel %vm536_vm3, %v1841_v9, -inf }
 0xc57   :  { %v1856_v12 = vsel %vm536_vm3, %v4020_v6, -inf  ;;  %v1865_v17 = vsel %vm536_vm3, %v1843_v14, -inf }
 0xc58   :  { %1851 = vmax.xlane.f32.xlu0 %v1850_v11  ;;  %1857 = vmax.xlane.f32.xlu1 %v1856_v12  ;;  %v1862_v16 = vsel %vm536_vm3, %v4024_v10, -inf }
 0xc5c   :  { %1860 = vmax.xlane.f32.xlu0 %v1859_v15  ;;  %1863 = vmax.xlane.f32.xlu1 %v1862_v16 }
 0xc60   :  { %1866 = vmax.xlane.f32.xlu0 %v1865_v17 }
 0xc6d   :  { %3441 = vrot.lane.b32.xlu1 %v3973_v34, %s4232_s0 }
 0xcdc   :  { %v1849_v42 = vpop.xlane.xlu1 %1848 }
 0xcdd   :  { %v1855_v18 = vpop.xlane.xlu0 %1854  ;;  %v1869_v19 = vsub.f32 %v1837_v60, %v1849_v42 }
 0xcde   :  { %v1871_v21 = vsub.f32 %v1839_v13, %v1855_v18 }
 0xcdf   :  { %v1878_v22 = vmul.f32 1.442695, %v1869_v19 }
 0xce0   :  { %v1882_v23 = vmul.f32 1.442695, %v1871_v21 }
 0xce1   :  { %3500 = vpow2.f32 %v1878_v22  ;;  %v1846_v37 = vpop.xlane.xlu0 %1845 }
 0xce2   :  { %v1868_v24 = vsub.f32 %v1836_v20, %v1846_v37  ;;  %3502 = vpow2.f32 %v1882_v23 }
 0xce4   :  { %v1876_v25 = vmul.f32 1.442695, %v1868_v24 }
 0xce5   :  { %v1852_v26 = vpop.xlane.xlu0 %1851  ;;  %v1858_v29 = vpop.xlane.xlu1 %1857 }
 0xce6   :  { %3504 = vpow2.f32 %v1876_v25  ;;  %v1870_v30 = vsub.f32 %v1838_v2, %v1852_v26  ;;  %v1872_v58 = vsub.f32 %v4020_v6, %v1858_v29 }
 0xce8   :  { %v1880_v31 = vmul.f32 1.442695, %v1870_v30  ;;  %v1884_v59 = vmul.f32 1.442695, %v1872_v58 }
 0xce9   :  { %v1861_v32 = vpop.xlane.xlu0 %1860  ;;  %v1864_v33 = vpop.xlane.xlu1 %1863 }
 0xcea   :  { %3506 = vpow2.f32 %v1880_v31  ;;  %v1873_v35 = vsub.f32 %v1841_v9, %v1861_v32  ;;  %v1874_v60 = vsub.f32 %v4024_v10, %v1864_v33 }
 0xceb   :  { %v3501_v36 = vpop.eup %3500 }
 0xcec   :  { %v1886_v38 = vmul.f32 1.442695, %v1873_v35  ;;  %v1895_v39 = vsel %vm536_vm3, %v3501_v36, 0.0  ;;  %v4037_v40 = vpop.eup %3502  ;;  %v1888_v61 = vmul.f32 1.442695, %v1874_v60 }
 0xced   :  { %v1867_v41 = vpop.xlane.xlu0 %1866  ;;  %1896 = vadd.xlane.f32.xlu0 %v1895_v39  ;;  %v3442_v43 = vpop.permute.xlu1 %3441  ;;  %v1901_v50 = vsel %vm536_vm3, %v4037_v40, 0.0  ;;  %v2829_v39 = vld [vmem:[%s4200_s4 + $0x20] sm:$0xff] }
 0xcee   :  { %3508 = vpow2.f32 %v1886_v38  ;;  %v1875_v44 = vsub.f32 %v1843_v14, %v1867_v41  ;;  %v3444_v45 = vunpack.i.h.bf16 %v3442_v43  ;;  %v3443_v46 = vunpack.i.l.bf16 %v3442_v43 }
 0xcf0   :  { %v3505_v47 = vpop.eup %3504  ;;  %v1890_v48 = vmul.f32 1.442695, %v1875_v44  ;;  %v3315_v49 = vpack.c.bf16 %v3444_v45, %v3443_v46 }
 0xcf1   :  { %1902 = vadd.xlane.f32.xlu0 %v1901_v50  ;;  %v1892_v51 = vsel %vm536_vm3, %v3505_v47, 0.0 }
 0xcf2   :  { %3510 = vpow2.f32 %v1890_v48  ;;  %1893 = vadd.xlane.f32.xlu1 %v1892_v51  ;;  %3316 = vmatprep.subr.bf16.mxu1 %v3315_v49  ;;  %v2832_v48 = vld [vmem:[%s4200_s4 + $0x38] sm:$0xff] }
 0xcf3   :  { %3318 = vmatpush3.bf16.msra.mxu1 %v3315_v49  ;;  %3512 = vpow2.f32 %v1884_v59 }
 0xcf4   :  { %v3507_v52 = vpop.eup %3506  ;;  %3514 = vpow2.f32 %v1888_v61 }
 0xcf5   :  { %v1898_v53 = vsel %vm536_vm3, %v3507_v52, 0.0 }
 0xcf6   :  { %1899 = vadd.xlane.f32.xlu1 %v1898_v53 }
 0xcf8   :  { %v4043_v54 = vpop.eup %3508 }
 0xcf9   :  { %v1907_v55 = vsel %vm536_vm3, %v4043_v54, 0.0 }
 0xcfa   :  { %1908 = vadd.xlane.f32.xlu0 %v1907_v55 }
 0xcfc   :  { %v4047_v56 = vpop.eup %3510 }
 0xcfd   :  { %v1913_v57 = vsel %vm536_vm3, %v4047_v56, 0.0  ;;  %v3513_v62 = vpop.eup %3512 }
 0xcfe   :  { %1914 = vadd.xlane.f32.xlu0 %v1913_v57  ;;  %v1904_v13 = vsel %vm536_vm3, %v3513_v62, 0.0  ;;  %v3515_v63 = vpop.eup %3514 }
 0xcff   :  { %v1910_v0 = vsel %vm536_vm3, %v3515_v63, 0.0 }
 0xd07   :  { %3451 = vrot.lane.b32.xlu1 %v3973_v34, %s4233_s19 }
 0xd14   :  { %3446 = vrot.lane.b32.xlu0 %v3973_v34, %s4234_s20 }
 0xd2b   :  { %1905 = vadd.xlane.f32.xlu1 %v1904_v13 }
 0xd2f   :  { %1911 = vadd.xlane.f32.xlu1 %v1910_v0 }
 0xd40   :  { %3456 = vrot.lane.b32.xlu1 %v3973_v34, %s4235_s21 }
 0xd7a   :  { %v1897_v20 = vpop.xlane.xlu0 %1896 }
 0xd7b   :  { %3516 = vrcp.f32 %v1897_v20  ;;  %v2834_v20 = vld [vmem:[%s4201_s5 + $0x1] ss:$0 sm:$0xff] }
 0xd7e   :  { %v1903_v2 = vpop.xlane.xlu0 %1902 }
 0xd7f   :  { %v1894_v1 = vpop.xlane.xlu1 %1893 }
 0xd80   :  { %3518 = vrcp.f32 %v1894_v1 }
 0xd83   :  { %v1900_v3 = vpop.xlane.xlu1 %1899 }
 0xd84   :  { %3520 = vrcp.f32 %v1900_v3 }
 0xd85   :  { %v3517_v8 = vpop.eup %3516  ;;  %3522 = vrcp.f32 %v1903_v2 }
 0xd86   :  { %v1919_v14 = vmul.f32 %v3517_v8, %v3501_v36 }
 0xd87   :  { %v1909_v4 = vpop.xlane.xlu0 %1908  ;;  %v3452_v7 = vpop.permute.xlu1 %3451 }
 0xd88   :  { %v3454_v5 = vunpack.i.h.bf16 %v3452_v7  ;;  %v3453_v6 = vunpack.i.l.bf16 %v3452_v7  ;;  %3524 = vrcp.f32 %v1909_v4 }
 0xd8a   :  { %v3519_v9 = vpop.eup %3518  ;;  %v3323_v10 = vpack.c.bf16 %v3454_v5, %v3453_v6 }
 0xd8b   :  { %v1915_v11 = vpop.xlane.xlu0 %1914  ;;  %v1917_v12 = vmul.f32 %v3519_v9, %v3505_v47  ;;  %v2831_v47 = vld [vmem:[%s4200_s4 + $0x30] sm:$0xff] }
 0xd8c   :  { %3324 = vmatprep.subr.bf16.mxu0 %v3323_v10  ;;  %v3335_v49 = vpack.c.bf16 %v2832_v48, %v2831_v47 }
 0xd8d   :  { %3138 = vmatprep.mubr.msk.f32.mxu1 %vm536_vm3, %v1917_v12  ;;  %3326 = vmatpush3.bf16.msra.mxu0 %v3323_v10 }
 0xd8e   :  { %v3521_v34 = vpop.eup %3520  ;;  %3139 = vmatmul.mubr.msk.f32.vlgmr.msra.gmra.mrb[20].mxu1 %vm536_vm3, %v1919_v14 }
 0xd8f   :  { %v3447_v15 = vpop.permute.xlu0 %3446  ;;  %v1921_v16 = vmul.f32 %v3521_v34, %v3507_v52  ;;  %v3523_v19 = vpop.eup %3522 }
 0xd90   :  { %v3449_v17 = vunpack.i.h.bf16 %v3447_v15  ;;  %v3448_v42 = vunpack.i.l.bf16 %v3447_v15  ;;  %v1923_v21 = vmul.f32 %v3523_v19, %v4037_v40  ;;  %v2830_v40 = vld [vmem:[%s4200_s4 + $0x28] sm:$0xff]  ;;  %v2843_v19 = vld [vmem:[%s4202_s6 + $0x30] sm:$0xff] }
 0xd91   :  { %3145 = vmatprep.mubr.msk.f32.mxu1 %vm536_vm3, %v1921_v16  ;;  %v3331_v43 = vpack.c.bf16 %v2830_v40, %v2829_v39 }
 0xd92   :  { %v3319_v18 = vpack.c.bf16 %v3449_v17, %v3448_v42  ;;  %v3525_v26 = vpop.eup %3524  ;;  %v2842_v42 = vld [vmem:[%s4202_s6 + $0x28] sm:$0xff] }
 0xd93   :  { %v1927_v32 = vmul.f32 %v3525_v26, %v4043_v54  ;;  %3332 = vmatprep.subr.bf16.mxu0 %v3331_v43  ;;  %v2852_v26 = vld [vmem:[%s4204_s8 + $0x58] sm:$0xff] }
 0xd94   :  { %3320 = vmatprep.subr.bf16.mxu1 %v3319_v18 }
 0xd95   :  { %3322 = vmatpush3.bf16.msra.mxu1 %v3319_v18 }
 0xd98   :  { %3146 = vmatmul.mubr.msk.f32.vlgmr.msra.gmra.mrb[22].mxu1 %vm536_vm3, %v1923_v21  ;;  %v2844_v21 = vld [vmem:[%s4202_s6 + $0x38] sm:$0xff] }
 0xdb8   :  { %v1906_v22 = vpop.xlane.xlu1 %1905 }
 0xdb9   :  { %3526 = vrcp.f32 %v1906_v22  ;;  %v3343_v22 = vpack.c.bf16 %v2844_v21, %v2843_v19  ;;  %v2863_v19 = vld [vmem:[%s4208_s12 + $0x1] ss:$0 sm:$0xff] }
 0xdba   :  { %3528 = vrcp.f32 %v1915_v11 }
 0xdbc   :  { %v1912_v23 = vpop.xlane.xlu1 %1911 }
 0xdbd   :  { %3530 = vrcp.f32 %v1912_v23  ;;  %v2849_v23 = vld [vmem:[%s4204_s8 + $0x40] sm:$0xff] }
 0xdc0   :  { %v3457_v37 = vpop.permute.xlu1 %3456 }
 0xdc1   :  { %v3459_v24 = vunpack.i.h.bf16 %v3457_v37  ;;  %v3458_v25 = vunpack.i.l.bf16 %v3457_v37  ;;  %v2850_v37 = vld [vmem:[%s4204_s8 + $0x48] sm:$0xff] }
 0xdc3   :  { %v3527_v29 = vpop.eup %3526  ;;  %v3327_v30 = vpack.c.bf16 %v3459_v24, %v3458_v25  ;;  %v2851_v24 = vld [vmem:[%s4204_s8 + $0x50] sm:$0xff]  ;;  %v3347_v25 = vpack.c.bf16 %v2850_v37, %v2849_v23  ;;  %v2864_v23 = vld [vmem:[%s4209_s13 + $0x1] ss:$0 sm:$0xff] }
 0xdc4   :  { %v1925_v31 = vmul.f32 %v3527_v29, %v3513_v62  ;;  %v3529_v33 = vpop.eup %3528  ;;  %v3351_v29 = vpack.c.bf16 %v2852_v26, %v2851_v24 }
 0xdc5   :  { %3328 = vmatprep.subr.bf16.mxu1 %v3327_v30  ;;  %v1931_v38 = vmul.f32 %v3529_v33, %v4047_v56 }
 0xdc6   :  { %3152 = vmatprep.mubr.msk.f32.mxu0 %vm536_vm3, %v1925_v31  ;;  %3330 = vmatpush3.bf16.msra.mxu1 %v3327_v30  ;;  %v2853_v30 = vld [vmem:[%s4204_s8 + $0x60] sm:$0xff]  ;;  %v2854_v31 = vld [vmem:[%s4204_s8 + $0x68] sm:$0xff] }
 0xdc7   :  { %v3531_v35 = vpop.eup %3530  ;;  %3153 = vmatmul.mubr.msk.f32.vlgmr.msra.gmra.mrb[14].mxu0 %vm536_vm3, %v1927_v32  ;;  %v3355_v32 = vpack.c.bf16 %v2854_v31, %v2853_v30 }
 0xdc8   :  { %v1929_v36 = vmul.f32 %v3531_v35, %v3515_v63  ;;  %3334 = vmatpush3.bf16.msra.mxu0 %v3331_v43  ;;  %v2839_v43 = vld [vmem:[%s4206_s10 + $0x1] ss:$0 sm:$0xff] }
 0xdc9   :  { %3336 = vmatprep.subr.bf16.mxu0 %v3335_v49 }
 0xdca   :  { %3159 = vmatprep.mubr.msk.f32.mxu1 %vm536_vm3, %v1929_v36 }
 0xdcb   :  { %3160 = vmatmul.mubr.msk.f32.vlgmr.msra.gmra.mrb[24].mxu1 %vm536_vm3, %v1931_v38 }
 0xdcc   :  { %3338 = vmatpush3.bf16.msra.mxu0 %v3335_v49 }
 0xdcd   :  { %3348 = vmatprep.subr.bf16.mxu0 %v3347_v25 }
 0xe61   :  { %v3140_v41 = vpop.f32.mrb[20].mxu1 }
 0xe62   :  { %v2010_v44 = vpop.f32.mrb[21].mxu1 }
 0xe6b   :  { %v3147_v45 = vpop.f32.mrb[22].mxu1 }
 0xe6c   :  { %2284 = vrot.lane.b32.xlu1 %v3147_v45, %s4236_s22  ;;  %v2097_v46 = vpop.f32.mrb[23].mxu1  ;;  %v2840_v45 = vld [vmem:[%s4207_s11 + $0x1] ss:$0 sm:$0xff] }
 0xe6d   :  { %2282 = vrot.lane.b32.xlu0 %v2097_v46, %s4236_s22 }
 0xe9a   :  { %v3154_v50 = vpop.f32.mrb[14].mxu0 }
 0xe9b   :  { %v2184_v51 = vpop.f32.mrb[15].mxu0  ;;  %2292 = vrot.lane.b32.xlu1 %v3154_v50, %s4237_s2 }
 0xe9c   :  { %2290 = vrot.lane.b32.xlu0 %v2184_v51, %s4237_s2  ;;  %s3566_s2 = scalar_lea.vmem %s2746_s1, 256 }
 0xe9d   :  { %p3567_p8 = scmp.ne.s32.totalorder %s2746_s1, %s3566_s2  ;;  %p3572_p10 = scmp.lt.s32.totalorder %s3566_s2, %s3566_s2 }
 0xe9e   :  { %v3161_v52 = vpop.f32.mrb[24].mxu1 }
 0xe9f   :  { %2300 = vrot.lane.b32.xlu1 %v3161_v52, %s4238_s25  ;;  %v2271_v53 = vpop.f32.mrb[25].mxu1  ;;  %v2855_v52 = vld [vmem:[%s4204_s8 + $0x70] sm:$0xff]  ;;  %p3573_p11 = por %p3572_p10, %p3571_p9 }
 0xea0   :  { %2298 = vrot.lane.b32.xlu0 %v2271_v53, %s4238_s25  ;;  %v2856_v53 = vld [vmem:[%s4204_s8 + $0x78] sm:$0xff] }
 0xea1   :  { %p3574_p12 = pnand %p3573_p11, %p3567_p8 }
 0xede   :  { %v2285_v54 = vpop.permute.xlu1 %2284 }
 0xedf   :  { %v2283_v55 = vpop.permute.xlu0 %2282  ;;  %v2305_v60 = vsel %vm171_vm1, %v3140_v41, %v2285_v54  ;;  %v3359_v54 = vpack.c.bf16 %v2856_v53, %v2855_v52  ;;  %v2865_v52 = vld [vmem:[%s4210_s14] ss:$0 sm:$0xff] }
 0xee0   :  { %v2304_v58 = vsel %vm171_vm1, %v2010_v44, %v2283_v55  ;;  %v2846_v55 = vld [vmem:[%s4203_s7 + $0x1] ss:$0 sm:$0xff] }
 0xf0d   :  { %v2293_v56 = vpop.permute.xlu1 %2292 }
 0xf0e   :  { %v2291_v57 = vpop.permute.xlu0 %2290  ;;  %v2307_v13 = vsel %vm536_vm3, %v2305_v60, %v2293_v56 }
 0xf0f   :  { %v2306_v61 = vsel %vm536_vm3, %v2304_v58, %v2291_v57 }
 0xf11   :  { %v2301_v59 = vpop.permute.xlu1 %2300 }
 0xf12   :  { %v2299_v62 = vpop.permute.xlu0 %2298  ;;  %v2309_v0 = vsel %vm1001_vm4, %v2307_v13, %v2301_v59 }
 0xf13   :  { %v2308_v63 = vsel %vm1001_vm4, %v2306_v61, %v2299_v62  ;;  %v2858_v62 = vld [vmem:[%s4205_s9 + $0x1] ss:$0 sm:$0xff] }
 0xf14   :  { %3170 = vmatprep.mubr.msk.f32.mxu0 %vm83_vm0, %v2308_v63 }
 0xf15   :  { %3171 = vmatmul.mubr.msk.f32.vlgmr.msra.gmra.mrb[16].mxu0 %vm83_vm0, %v2309_v0 }
 0xf16   :  { %3350 = vmatpush3.bf16.msra.mxu0 %v3347_v25 }
 0xf17   :  { %3352 = vmatprep.subr.bf16.mxu0 %v3351_v29 }
 0xf1a   :  { %3354 = vmatpush3.bf16.msra.mxu0 %v3351_v29 }
 0xf1b   :  { %3356 = vmatprep.subr.bf16.mxu0 %v3355_v32 }
 0xf1e   :  { %3358 = vmatpush3.bf16.msra.mxu0 %v3355_v32 }
 0xf1f   :  { %3360 = vmatprep.subr.bf16.mxu0 %v3359_v54 }
 0xf22   :  { %3362 = vmatpush3.bf16.msra.mxu0 %v3359_v54 }
 0xfe8   :  { %v3172_v1 = vpop.f32.mrb[16].mxu0 }
 0xfe9   :  { %v2401_v2 = vadd.f32 %v3172_v1, %v2834_v20  ;;  %v2395_v3 = vpop.f32.mrb[17].mxu0 }
 0xfea   :  { %v2396_v4 = vadd.f32 %v2834_v20, %v2395_v3 }
 0xfeb   :  { %v2405_v7 = vadd.f32 %v2401_v2, %v3963_v28 }
 0xfec   :  { %v2404_v5 = vadd.f32 %v2396_v4, %v3961_v27  ;;  %v2841_v27 = vld [vmem:[%s4202_s6 + $0x20] sm:$0xff] }
 0xfed   :  { %v2413_v6 = vsel %vm83_vm0, %v2405_v7, 0.0  ;;  %v3339_v18 = vpack.c.bf16 %v2842_v42, %v2841_v27 }
 0xfee   :  { %2414 = vadd.xlane.f32.xlu1 %v2413_v6  ;;  %v2410_v8 = vsel %vm83_vm0, %v2404_v5, 0.0 }
 0xfef   :  { %2411 = vadd.xlane.f32.xlu0 %v2410_v8  ;;  %3340 = vmatprep.subr.bf16.mxu1 %v3339_v18 }
 0xff0   :  { %3342 = vmatpush3.bf16.msra.mxu1 %v3339_v18 }
 0xff1   :  { %3344 = vmatprep.subr.bf16.mxu1 %v3343_v22 }
 0xff4   :  { %3346 = vmatpush3.bf16.msra.mxu1 %v3343_v22 }
0x107b   :  { %v2415_v9 = vpop.xlane.xlu1 %2414 }
0x107c   :  { %v2417_v10 = vmul.f32 0.03125, %v2415_v9  ;;  %v2412_v11 = vpop.xlane.xlu0 %2411 }
0x107d   :  { %v2416_v12 = vmul.f32 0.03125, %v2412_v11 }
0x107e   :  { %v2419_v14 = vsub.f32 %v2405_v7, %v2417_v10 }
0x107f   :  { %v2418_v34 = vsub.f32 %v2404_v5, %v2416_v12 }
0x1080   :  { %v2421_v17 = vmul.f32 %v2419_v14, %v2419_v14 }
0x1081   :  { %v2420_v15 = vmul.f32 %v2418_v34, %v2418_v34 }
0x1082   :  { %v2425_v28 = vsel %vm83_vm0, %v2421_v17, 0.0 }
0x1083   :  { %v2422_v16 = vsel %vm83_vm0, %v2420_v15, 0.0 }
0x1084   :  { %2423 = vadd.xlane.f32.xlu0 %v2422_v16 }
0x1088   :  { %2426 = vadd.xlane.f32.xlu0 %v2425_v28 }
0x1111   :  { %v2424_v33 = vpop.xlane.xlu0 %2423 }
0x1112   :  { %v2428_v35 = vmul.f32 0.03125, %v2424_v33 }
0x1114   :  { %v2430_v36 = vadd.f32 1e-05, %v2428_v35 }
0x1115   :  { %v2427_v38 = vpop.xlane.xlu0 %2426 }
0x1116   :  { %3532 = vrsqrt.f32 %v2430_v36  ;;  %v2429_v39 = vmul.f32 0.03125, %v2427_v38 }
0x1118   :  { %v2431_v40 = vadd.f32 1e-05, %v2429_v39 }
0x111a   :  { %3534 = vrsqrt.f32 %v2431_v40 }
0x1120   :  { %v3533_v41 = vpop.eup %3532 }
0x1121   :  { %v2434_v44 = vmul.f32 %v3533_v41, %v2418_v34 }
0x1123   :  { %v2442_v46 = vmul.f32 %v2839_v43, %v2434_v44 }
0x1124   :  { %v3535_v47 = vpop.eup %3534 }
0x1125   :  { %v2435_v48 = vmul.f32 %v3535_v47, %v2419_v14  ;;  %v2450_v49 = vadd.f32 %v2840_v45, %v2442_v46 }
0x1127   :  { %v2443_v50 = vmul.f32 %v2839_v43, %v2435_v48  ;;  %3181 = vmatprep.mubr.msk.f32.mxu1 %vm83_vm0, %v2450_v49 }
0x1129   :  { %v2451_v51 = vadd.f32 %v2840_v45, %v2443_v50 }
0x112b   :  { %3182 = vmatmul.mubr.msk.f32.vlgmr.msra.gmra.mrb[26].mxu1 %vm83_vm0, %v2451_v51 }
0x11fe   :  { %v3183_v56 = vpop.f32.mrb[26].mxu1 }
0x11ff   :  { %v2543_v57 = vadd.f32 %v3183_v56, %v2846_v55  ;;  %v2537_v58 = vpop.f32.mrb[27].mxu1  ;;  %v2866_v56 = vld [vmem:[%s4211_s15] ss:$0 sm:$0xff] }
0x1200   :  { %v2538_v59 = vadd.f32 %v2846_v55, %v2537_v58 }
0x1201   :  { %v2547_v61 = vmax.f32 %v2543_v57, 0.0 }
0x1202   :  { %v2546_v60 = vmax.f32 %v2538_v59, 0.0 }
0x1204   :  { %3200 = vmatprep.mubr.msk.f32.mxu0 %vm1252_vm5, %v2546_v60 }
0x1205   :  { %3201 = vmatmul.mubr.msk.f32.vlgmr.msra.gmra.mrb[18].mxu0 %vm1252_vm5, %v2547_v61 }
0x12d8   :  { %v3202_v13 = vpop.f32.mrb[18].mxu0 }
0x12d9   :  { %v2643_v63 = vadd.f32 %v3202_v13, %v2858_v62  ;;  %v2637_v0 = vpop.f32.mrb[19].mxu0 }
0x12da   :  { %v2638_v20 = vadd.f32 %v2858_v62, %v2637_v0 }
0x12db   :  { %v2647_v1 = vadd.f32 %v2643_v63, %v2451_v51 }
0x12dc   :  { %v2646_v2 = vadd.f32 %v2638_v20, %v2450_v49 }
0x12dd   :  { %v2655_v3 = vsel %vm83_vm0, %v2647_v1, 0.0 }
0x12de   :  { %2656 = vadd.xlane.f32.xlu0 %v2655_v3  ;;  %v2652_v4 = vsel %vm83_vm0, %v2646_v2, 0.0 }
0x12df   :  { %2653 = vadd.xlane.f32.xlu1 %v2652_v4 }
0x136b   :  { %v2657_v7 = vpop.xlane.xlu0 %2656 }
0x136c   :  { %v2659_v5 = vmul.f32 0.03125, %v2657_v7  ;;  %v2654_v6 = vpop.xlane.xlu1 %2653 }
0x136d   :  { %v2658_v8 = vmul.f32 0.03125, %v2654_v6 }
0x136e   :  { %v2661_v9 = vsub.f32 %v2647_v1, %v2659_v5 }
0x136f   :  { %v2660_v10 = vsub.f32 %v2646_v2, %v2658_v8 }
0x1370   :  { %v2663_v11 = vmul.f32 %v2661_v9, %v2661_v9 }
0x1371   :  { %v2662_v12 = vmul.f32 %v2660_v10, %v2660_v10 }
0x1372   :  { %v2667_v14 = vsel %vm83_vm0, %v2663_v11, 0.0 }
0x1373   :  { %2668 = vadd.xlane.f32.xlu0 %v2667_v14  ;;  %v2664_v34 = vsel %vm83_vm0, %v2662_v12, 0.0 }
0x1374   :  { %2665 = vadd.xlane.f32.xlu1 %v2664_v34 }
0x1400   :  { %v2669_v15 = vpop.xlane.xlu0 %2668 }
0x1401   :  { %v2671_v16 = vmul.f32 0.03125, %v2669_v15  ;;  %v2666_v17 = vpop.xlane.xlu1 %2665 }
0x1402   :  { %v2670_v28 = vmul.f32 0.03125, %v2666_v17 }
0x1403   :  { %v2673_v27 = vadd.f32 1e-05, %v2671_v16 }
0x1404   :  { %v2672_v42 = vadd.f32 1e-05, %v2670_v28 }
0x1405   :  { %3536 = vrsqrt.f32 %v2673_v27 }
0x1406   :  { %3538 = vrsqrt.f32 %v2672_v42 }
0x140f   :  { %v3537_v18 = vpop.eup %3536 }
0x1410   :  { %v3539_v21 = vpop.eup %3538  ;;  %v2677_v22 = vmul.f32 %v3537_v18, %v2661_v9 }
0x1411   :  { %v2676_v37 = vmul.f32 %v3539_v21, %v2660_v10 }
0x1412   :  { %v2685_v24 = vmul.f32 %v2863_v19, %v2677_v22 }
0x1413   :  { %v2684_v25 = vmul.f32 %v2863_v19, %v2676_v37 }
0x1414   :  { %v2693_v26 = vadd.f32 %v2864_v23, %v2685_v24 }
0x1415   :  { %v2692_v29 = vadd.f32 %v2864_v23, %v2684_v25 }
0x1416   :  { %v2699_v30 = vsel %vm83_vm0, %v2693_v26, 0.0 }
0x1417   :  { %2700 = vadd.xlane.f32.xlu0 %v2699_v30  ;;  %v2696_v31 = vsel %vm83_vm0, %v2692_v29, 0.0 }
0x1418   :  { %2697 = vadd.xlane.f32.xlu1 %v2696_v31 }
0x14a4   :  { %v2701_v32 = vpop.xlane.xlu0 %2700 }
0x14a5   :  { %v2703_v33 = vmul.f32 0.03125, %v2701_v32  ;;  %v2698_v35 = vpop.xlane.xlu1 %2697 }
0x14a6   :  { %v2702_v36 = vmul.f32 0.03125, %v2698_v35 }
0x14a7   :  { %v2705_v38 = vsub.f32 %v2693_v26, %v2703_v33 }
0x14a8   :  { %v2704_v39 = vsub.f32 %v2692_v29, %v2702_v36 }
0x14a9   :  { %v2707_v40 = vmul.f32 %v2705_v38, %v2705_v38 }
0x14aa   :  { %v2706_v41 = vmul.f32 %v2704_v39, %v2704_v39 }
0x14ab   :  { %v2711_v43 = vsel %vm83_vm0, %v2707_v40, 0.0 }
0x14ac   :  { %2712 = vadd.xlane.f32.xlu0 %v2711_v43  ;;  %v2708_v44 = vsel %vm83_vm0, %v2706_v41, 0.0 }
0x14ad   :  { %2709 = vadd.xlane.f32.xlu1 %v2708_v44 }
0x1539   :  { %v2713_v45 = vpop.xlane.xlu0 %2712 }
0x153a   :  { %v2715_v46 = vmul.f32 0.03125, %v2713_v45  ;;  %v2710_v47 = vpop.xlane.xlu1 %2709 }
0x153b   :  { %v2714_v48 = vmul.f32 0.03125, %v2710_v47 }
0x153c   :  { %v2717_v49 = vadd.f32 1e-05, %v2715_v46 }
0x153d   :  { %v2716_v50 = vadd.f32 1e-05, %v2714_v48 }
0x153e   :  { %3540 = vrsqrt.f32 %v2717_v49 }
0x153f   :  { %3542 = vrsqrt.f32 %v2716_v50 }
0x1548   :  { %v3541_v51 = vpop.eup %3540 }
0x1549   :  { %v3543_v53 = vpop.eup %3542  ;;  %v2721_v54 = vmul.f32 %v3541_v51, %v2705_v38 }
0x154a   :  { %v2720_v55 = vmul.f32 %v3543_v53, %v2704_v39 }
0x154b   :  { %v2729_v57 = vmul.f32 %v2865_v52, %v2721_v54 }
0x154c   :  { %v2728_v58 = vmul.f32 %v2865_v52, %v2720_v55 }
0x154d   :  { %v2737_v59 = vadd.f32 %v2866_v56, %v2729_v57 }
0x154e   :  { %v2736_v60 = vadd.f32 %v2866_v56, %v2728_v58 }
0x154f   :  { %2739 = vst.msk [vmem:[#allocation5 + $0x8] sm:$0xff] %vm83_vm0, %v2737_v59 }
0x1550   :  { %2738 = vst.msk [vmem:[#allocation5] sm:$0xff] %vm83_vm0, %v2736_v60 }
0x1551   :  { %3577 = shalt.err (!%p3574_p12)
}
0x1552   :  { %s3578_s6 = scalar_lea.hbm %s4212_s16, 256 }
0x1553   :  { %p3579_p13 = scmp.ne.s32.totalorder %s4212_s16, %s3578_s6  ;;  %p3582_p0 = scmp.lt.u32.totalorder %s3578_s6, %s4212_s16 }
0x1555   :  { %p3584_p1 = pnand %p3582_p0, %p3579_p13 }
0x1557   :  { %3587 = shalt.err (!%p3584_p1)
}
0x1558   :  { %s4239_s17 = smov 128  }
0x1559   :  { %2751 = dma.vmem_to_hbm [thread:$0]  %s2746_s1, 256, %s4212_s16, [#allocation4], %s4239_s17, %s4239_s17, %s4236_s22  }
0x155a   :  { %3590 = dma.done.wait [#allocation4], 256  }
0x155b   :  { %3591 = vsyncadd [#allocation4], 4294967040 }
0x155c   :  { %2755 = vsyncpa [#allocation3], 1 }
0x155d   :  { %2756 = vsyncpa [#allocation4], 1 }

</bundles_post_ra>
